<compile_context>
chip_gen: v6e
topology: v6e:2x2x1
jax: 0.10.0
libtpu: 0.0.40
codegen_flags: <defaults>
</compile_context>

<pallas_src>
import jax
import jax.numpy as jnp
from jax.experimental import pallas as pl
from jax.experimental.pallas import tpu as pltpu

KSIZE = 7
PAD = KSIZE // 2
VMEM_LIMIT = 32 * 1024 * 1024          # safe on v5e / v6e / v7x
FUSE_LIMIT_BYTES = 2 * 1024 * 1024     # max bytes of one (C, H*W) input block for fused path


def _attention_map(w_ref, pf_ref, avg, mx, *, H, W):
    """sigmoid(conv7x7(stack([avg, max]))) in flat lane-dense (1, H*W) form.

    w_ref : SMEM (2*K*K,) f32, layout [in_channel, ky, kx]
    pf_ref: VMEM (2, L) f32 scratch, L = H*W + 2*PAD*W + 2*PAD
    avg,mx: (1, H*W) f32 pooled maps (row-major flattened)
    """
    HW = H * W
    IOFF = PAD * W + PAD   # flat offset of pooled element (0, 0) inside the padded map

    # Zero-padded, row-major-flattened pooled maps: the vertical padding rows
    # and the +-PAD horizontal guard are contiguous zero ranges in flat space.
    pf_ref[...] = jnp.zeros_like(pf_ref)
    pf_ref[0:1, IOFF:IOFF + HW] = avg
    pf_ref[1:2, IOFF:IOFF + HW] = mx

    col = jax.lax.broadcasted_iota(jnp.int32, (1, HW), 1) % W
    acc = jnp.zeros((1, HW), jnp.float32)
    for dx in range(KSIZE):
        term = jnp.zeros((1, HW), jnp.float32)
        for dy in range(KSIZE):
            s = dy * W + dx                      # flat tap offset
            w_avg = w_ref[dy * KSIZE + dx]
            w_max = w_ref[KSIZE * KSIZE + dy * KSIZE + dx]
            term = term + w_avg * pf_ref[0:1, s:s + HW]
            term = term + w_max * pf_ref[1:2, s:s + HW]
        # Columns whose horizontal tap x+dx-PAD falls outside [0, W) would read
        # a neighbouring row in flat space -> mask to the zero-padding value.
        valid = (col >= PAD - dx) & (col < W + PAD - dx)
        acc = acc + jnp.where(valid, term, 0.0)
    return jax.nn.sigmoid(acc)


def spatial_attention(x, weight):
    """x: (B, C, H, W); weight: (1, 2, K, K) conv weight (no bias). Returns (B, C, H, W)."""
    B, C, H, W = x.shape
    HW = H * W
    L = HW + 2 * PAD * W + 2 * PAD

    w_flat = weight.reshape(-1).astype(jnp.float32)   # (2*K*K,), [c][ky][kx]
    x_flat = x.reshape(B, C, HW)                      # free metadata reshape
    itemsize = x.dtype.itemsize

    if C * HW * itemsize <= FUSE_LIMIT_BYTES:
        # ---------- fused path: one grid step per batch element, x read once ----------
        def fused_kernel(w_ref, x_ref, o_ref, pf_ref):
            xb = x_ref[...].astype(jnp.float32)                # (C, HW)
            avg = jnp.mean(xb, axis=0, keepdims=True)          # (1, HW)
            mx = jnp.max(xb, axis=0, keepdims=True)            # (1, HW)
            attn = _attention_map(w_ref, pf_ref, avg, mx, H=H, W=W)
            o_ref[...] = (xb * attn).astype(o_ref.dtype)

        out = pl.pallas_call(
            fused_kernel,
            out_shape=jax.ShapeDtypeStruct((B, C, HW), x.dtype),
            grid=(B,),
            in_specs=[
                pl.BlockSpec(memory_space=pltpu.MemorySpace.SMEM),     # conv weights
                pl.BlockSpec((None, C, HW), lambda b: (b, 0, 0)),      # x
            ],
            out_specs=pl.BlockSpec((None, C, HW), lambda b: (b, 0, 0)),
            scratch_shapes=[pltpu.VMEM((2, L), jnp.float32)],
            compiler_params=pltpu.CompilerParams(
                dimension_semantics=("parallel",),
                vmem_limit_bytes=VMEM_LIMIT),
        )(w_flat, x_flat)
        return out.reshape(B, C, H, W)

    # ---------- channel-tiled two-pass path (large C) ----------
    # TODO(synk): very large H*W with tiny C would additionally need spatial tiling.
    tc = max(8, min(512, (FUSE_LIMIT_BYTES // (HW * itemsize)) // 8 * 8))
    nct = pl.cdiv(C, tc)

    def pool_kernel(x_ref, pooled_ref):
        c = pl.program_id(1)
        xb = x_ref[...].astype(jnp.float32)                    # (tc, HW)
        if C % tc != 0:                                        # static (Python) decision
            ch = c * tc + jax.lax.broadcasted_iota(jnp.int32, (tc, 1), 0)
            valid = ch < C
            xs = jnp.where(valid, xb, 0.0)
            xm = jnp.where(valid, xb, -jnp.inf)
        else:
            xs, xm = xb, xb
        psum = jnp.sum(xs, axis=0, keepdims=True)              # (1, HW)
        pmax = jnp.max(xm, axis=0, keepdims=True)              # (1, HW)

        @pl.when(c == 0)
        def _():
            pooled_ref[0:1, :] = psum
            pooled_ref[1:2, :] = pmax

        @pl.when(c != 0)
        def _():
            pooled_ref[0:1, :] = pooled_ref[0:1, :] + psum
            pooled_ref[1:2, :] = jnp.maximum(pooled_ref[1:2, :], pmax)

        @pl.when(c == pl.num_programs(1) - 1)
        def _():
            pooled_ref[0:1, :] = pooled_ref[0:1, :] * (1.0 / C)

    pooled = pl.pallas_call(
        pool_kernel,
        out_shape=jax.ShapeDtypeStruct((B, 2, HW), jnp.float32),
        grid=(B, nct),
        in_specs=[pl.BlockSpec((None, tc, HW), lambda b, c: (b, c, 0))],
        out_specs=pl.BlockSpec((None, 2, HW), lambda b, c: (b, 0, 0)),
        compiler_params=pltpu.CompilerParams(
            dimension_semantics=("parallel", "arbitrary"),
            vmem_limit_bytes=VMEM_LIMIT),
    )(x_flat)

    def mod_kernel(w_ref, pooled_ref, x_ref, o_ref, pf_ref):
        attn = _attention_map(w_ref, pf_ref,
                              pooled_ref[0:1, :], pooled_ref[1:2, :], H=H, W=W)
        o_ref[...] = (x_ref[...].astype(jnp.float32) * attn).astype(o_ref.dtype)

    out = pl.pallas_call(
        mod_kernel,
        out_shape=jax.ShapeDtypeStruct((B, C, HW), x.dtype),
        grid=(B, nct),
        in_specs=[
            pl.BlockSpec(memory_space=pltpu.MemorySpace.SMEM),         # conv weights
            pl.BlockSpec((None, 2, HW), lambda b, c: (b, 0, 0)),       # pooled maps
            pl.BlockSpec((None, tc, HW), lambda b, c: (b, c, 0)),      # x
        ],
        out_specs=pl.BlockSpec((None, tc, HW), lambda b, c: (b, c, 0)),
        scratch_shapes=[pltpu.VMEM((2, L), jnp.float32)],
        compiler_params=pltpu.CompilerParams(
            dimension_semantics=("parallel", "parallel"),
            vmem_limit_bytes=VMEM_LIMIT),
    )(w_flat, pooled, x_flat)
    return out.reshape(B, C, H, W)


def spatial_attention_ref(x, weight):
    """Pure-JAX reference mirroring the PyTorch forward."""
    avg_out = jnp.mean(x, axis=1, keepdims=True)
    max_out = jnp.max(x, axis=1, keepdims=True)
    cat = jnp.concatenate([avg_out, max_out], axis=1)
    conv = jax.lax.conv_general_dilated(
        cat, weight, window_strides=(1, 1), padding="SAME",
        dimension_numbers=("NCHW", "OIHW", "NCHW"))
    return x * jax.nn.sigmoid(conv)


if __name__ == "__main__":
    B, C, H, W = 2, 4, 16, 16

    key = jax.random.PRNGKey(0)
    kx, kw = jax.random.split(key)
    x = jax.random.normal(kx, (B, C, H, W), dtype=jnp.float32)
    # Deterministic synthetic conv weight, matches nn.Conv2d(2, 1, 7, bias=False)
    fan_in = 2 * KSIZE * KSIZE
    weight = jax.random.uniform(
        kw, (1, 2, KSIZE, KSIZE), dtype=jnp.float32,
        minval=-1.0 / (fan_in ** 0.5), maxval=1.0 / (fan_in ** 0.5))

    out = jax.block_until_ready(spatial_attention(x, weight))
    ref = jax.block_until_ready(spatial_attention_ref(x, weight))

    assert out.shape == (B, C, H, W), out.shape
    err = jnp.max(jnp.abs(out - ref))
    assert jnp.allclose(out, ref, atol=1e-5, rtol=1e-5), f"max abs err {err}"
    print("KERNEL_OK")
</pallas_src>

<mosaic_0001>
module attributes {stable_mosaic.version = 11 : i64} {
  func.func @fused_kernel(%arg0: i32, %arg1: memref<98xf32, #tpu.memory_space<smem>>, %arg2: memref<1x4x256xf32, #tpu.memory_space<vmem>>, %arg3: memref<1x4x256xf32, #tpu.memory_space<vmem>>, %arg4: memref<2x358xf32, #tpu.memory_space<vmem>>) attributes {dimension_semantics = [#tpu.dimension_semantics<parallel>], iteration_bounds = array<i64: 2>, scalar_prefetch = 0 : i64, scratch_operands = 1 : i64, tpu.core_type = #tpu.core_type<tc>, window_params = [{transform_indices = @transform_0, window_bounds = array<i64: 98>}, {transform_indices = @transform_1, window_bounds = array<i64: 1, 4, 256>}, {transform_indices = @transform_2, window_bounds = array<i64: 1, 4, 256>}]} {
    %c0 = arith.constant 0 : index
    %c0_0 = arith.constant 0 : index
    %c0_1 = arith.constant 0 : index
    %0 = vector.load %arg2[%c0, %c0_0, %c0_1] : memref<1x4x256xf32, #tpu.memory_space<vmem>>, vector<1x4x256xf32>
    %1 = vector.shape_cast %0 : vector<1x4x256xf32> to vector<4x256xf32>
    %cst = arith.constant dense<0.000000e+00> : vector<256xf32>
    %2 = vector.multi_reduction <add>, %1, %cst [0] : vector<4x256xf32> to vector<256xf32>
    %3 = vector.shape_cast %2 : vector<256xf32> to vector<1x256xf32>
    %cst_2 = arith.constant 4.000000e+00 : f32
    %4 = vector.broadcast %cst_2 : f32 to vector<1x256xf32>
    %5 = arith.divf %3, %4 : vector<1x256xf32>
    %cst_3 = arith.constant dense<0xFF800000> : vector<256xf32>
    %6 = vector.multi_reduction <maximumf>, %1, %cst_3 [0] : vector<4x256xf32> to vector<256xf32>
    %7 = vector.shape_cast %6 : vector<256xf32> to vector<1x256xf32>
    %cst_4 = arith.constant 0.000000e+00 : f32
    %8 = vector.broadcast %cst_4 : f32 to vector<2x358xf32>
    %c0_5 = arith.constant 0 : index
    %c0_6 = arith.constant 0 : index
    %9 = vector.load %arg4[%c0_5, %c0_6] : memref<2x358xf32, #tpu.memory_space<vmem>>, vector<2x358xf32>
    tpu.vector_store %arg4[%c0_5, %c0_6], %8 {strides = array<i32>} : memref<2x358xf32, #tpu.memory_space<vmem>>, vector<2x358xf32>,
    %c0_7 = arith.constant 0 : index
    %c51 = arith.constant 51 : index
    %10 = vector.load %arg4[%c0_7, %c51] : memref<2x358xf32, #tpu.memory_space<vmem>>, vector<1x256xf32>
    tpu.vector_store %arg4[%c0_7, %c51], %5 {strides = array<i32>} : memref<2x358xf32, #tpu.memory_space<vmem>>, vector<1x256xf32>,
    %c1 = arith.constant 1 : index
    %c51_8 = arith.constant 51 : index
    %11 = vector.load %arg4[%c1, %c51_8] : memref<2x358xf32, #tpu.memory_space<vmem>>, vector<1x256xf32>
    tpu.vector_store %arg4[%c1, %c51_8], %7 {strides = array<i32>} : memref<2x358xf32, #tpu.memory_space<vmem>>, vector<1x256xf32>,
    %12 = tpu.iota {dimensions = array<i32: 1>} : vector<1x256xi32>
    %c16_i32 = arith.constant 16 : i32
    %c0_i32 = arith.constant 0 : i32
    %13 = arith.cmpi eq, %c16_i32, %c0_i32 : i32
    %c1_i32 = arith.constant 1 : i32
    %14 = arith.select %13, %c1_i32, %c16_i32 : i32
    %15 = vector.broadcast %14 : i32 to vector<1x256xi32>
    %16 = arith.remsi %12, %15 : vector<1x256xi32>
    %c0_i32_9 = arith.constant 0 : i32
    %17 = vector.broadcast %c0_i32_9 : i32 to vector<1x256xi32>
    %18 = arith.cmpi ne, %16, %17 : vector<1x256xi32>
    %c0_i32_10 = arith.constant 0 : i32
    %19 = vector.broadcast %c0_i32_10 : i32 to vector<1x256xi32>
    %20 = arith.cmpi slt, %16, %19 : vector<1x256xi32>
    %c0_i32_11 = arith.constant 0 : i32
    %21 = arith.cmpi slt, %14, %c0_i32_11 : i32
    %22 = vector.broadcast %21 : i1 to vector<1x256xi1>
    %23 = vector.broadcast %22 : vector<1x256xi1> to vector<1x256xi1>
    %24 = arith.xori %20, %23 : vector<1x256xi1>
    %25 = arith.andi %24, %18 : vector<1x256xi1>
    %26 = vector.broadcast %14 : i32 to vector<1x256xi32>
    %27 = arith.addi %16, %26 : vector<1x256xi32>
    %28 = arith.select %25, %27, %16 : vector<1x256xi1>, vector<1x256xi32>
    %cst_12 = arith.constant 0.000000e+00 : f32
    %29 = vector.broadcast %cst_12 : f32 to vector<1x256xf32>
    %cst_13 = arith.constant 0.000000e+00 : f32
    %30 = vector.broadcast %cst_13 : f32 to vector<1x256xf32>
    %c0_14 = arith.constant 0 : index
    %31 = memref.load %arg1[%c0_14] : memref<98xf32, #tpu.memory_space<smem>>
    %c49 = arith.constant 49 : index
    %32 = memref.load %arg1[%c49] : memref<98xf32, #tpu.memory_space<smem>>
    %c0_15 = arith.constant 0 : index
    %c0_16 = arith.constant 0 : index
    %33 = vector.load %arg4[%c0_15, %c0_16] : memref<2x358xf32, #tpu.memory_space<vmem>>, vector<1x256xf32>
    %34 = vector.broadcast %31 : f32 to vector<1x256xf32>
    %35 = arith.mulf %34, %33 : vector<1x256xf32>
    %36 = arith.addf %30, %35 : vector<1x256xf32>
    %c1_17 = arith.constant 1 : index
    %c0_18 = arith.constant 0 : index
    %37 = vector.load %arg4[%c1_17, %c0_18] : memref<2x358xf32, #tpu.memory_space<vmem>>, vector<1x256xf32>
    %38 = vector.broadcast %32 : f32 to vector<1x256xf32>
    %39 = arith.mulf %38, %37 : vector<1x256xf32>
    %40 = arith.addf %36, %39 : vector<1x256xf32>
    %c7 = arith.constant 7 : index
    %41 = memref.load %arg1[%c7] : memref<98xf32, #tpu.memory_space<smem>>
    %c56 = arith.constant 56 : index
    %42 = memref.load %arg1[%c56] : memref<98xf32, #tpu.memory_space<smem>>
    %c0_19 = arith.constant 0 : index
    %c16 = arith.constant 16 : index
    %43 = vector.load %arg4[%c0_19, %c16] : memref<2x358xf32, #tpu.memory_space<vmem>>, vector<1x256xf32>
    %44 = vector.broadcast %41 : f32 to vector<1x256xf32>
    %45 = arith.mulf %44, %43 : vector<1x256xf32>
    %46 = arith.addf %40, %45 : vector<1x256xf32>
    %c1_20 = arith.constant 1 : index
    %c16_21 = arith.constant 16 : index
    %47 = vector.load %arg4[%c1_20, %c16_21] : memref<2x358xf32, #tpu.memory_space<vmem>>, vector<1x256xf32>
    %48 = vector.broadcast %42 : f32 to vector<1x256xf32>
    %49 = arith.mulf %48, %47 : vector<1x256xf32>
    %50 = arith.addf %46, %49 : vector<1x256xf32>
    %c14 = arith.constant 14 : index
    %51 = memref.load %arg1[%c14] : memref<98xf32, #tpu.memory_space<smem>>
    %c63 = arith.constant 63 : index
    %52 = memref.load %arg1[%c63] : memref<98xf32, #tpu.memory_space<smem>>
    %c0_22 = arith.constant 0 : index
    %c32 = arith.constant 32 : index
    %53 = vector.load %arg4[%c0_22, %c32] : memref<2x358xf32, #tpu.memory_space<vmem>>, vector<1x256xf32>
    %54 = vector.broadcast %51 : f32 to vector<1x256xf32>
    %55 = arith.mulf %54, %53 : vector<1x256xf32>
    %56 = arith.addf %50, %55 : vector<1x256xf32>
    %c1_23 = arith.constant 1 : index
    %c32_24 = arith.constant 32 : index
    %57 = vector.load %arg4[%c1_23, %c32_24] : memref<2x358xf32, #tpu.memory_space<vmem>>, vector<1x256xf32>
    %58 = vector.broadcast %52 : f32 to vector<1x256xf32>
    %59 = arith.mulf %58, %57 : vector<1x256xf32>
    %60 = arith.addf %56, %59 : vector<1x256xf32>
    %c21 = arith.constant 21 : index
    %61 = memref.load %arg1[%c21] : memref<98xf32, #tpu.memory_space<smem>>
    %c70 = arith.constant 70 : index
    %62 = memref.load %arg1[%c70] : memref<98xf32, #tpu.memory_space<smem>>
    %c0_25 = arith.constant 0 : index
    %c48 = arith.constant 48 : index
    %63 = vector.load %arg4[%c0_25, %c48] : memref<2x358xf32, #tpu.memory_space<vmem>>, vector<1x256xf32>
    %64 = vector.broadcast %61 : f32 to vector<1x256xf32>
    %65 = arith.mulf %64, %63 : vector<1x256xf32>
    %66 = arith.addf %60, %65 : vector<1x256xf32>
    %c1_26 = arith.constant 1 : index
    %c48_27 = arith.constant 48 : index
    %67 = vector.load %arg4[%c1_26, %c48_27] : memref<2x358xf32, #tpu.memory_space<vmem>>, vector<1x256xf32>
    %68 = vector.broadcast %62 : f32 to vector<1x256xf32>
    %69 = arith.mulf %68, %67 : vector<1x256xf32>
    %70 = arith.addf %66, %69 : vector<1x256xf32>
    %c28 = arith.constant 28 : index
    %71 = memref.load %arg1[%c28] : memref<98xf32, #tpu.memory_space<smem>>
    %c77 = arith.constant 77 : index
    %72 = memref.load %arg1[%c77] : memref<98xf32, #tpu.memory_space<smem>>
    %c0_28 = arith.constant 0 : index
    %c64 = arith.constant 64 : index
    %73 = vector.load %arg4[%c0_28, %c64] : memref<2x358xf32, #tpu.memory_space<vmem>>, vector<1x256xf32>
    %74 = vector.broadcast %71 : f32 to vector<1x256xf32>
    %75 = arith.mulf %74, %73 : vector<1x256xf32>
    %76 = arith.addf %70, %75 : vector<1x256xf32>
    %c1_29 = arith.constant 1 : index
    %c64_30 = arith.constant 64 : index
    %77 = vector.load %arg4[%c1_29, %c64_30] : memref<2x358xf32, #tpu.memory_space<vmem>>, vector<1x256xf32>
    %78 = vector.broadcast %72 : f32 to vector<1x256xf32>
    %79 = arith.mulf %78, %77 : vector<1x256xf32>
    %80 = arith.addf %76, %79 : vector<1x256xf32>
    %c35 = arith.constant 35 : index
    %81 = memref.load %arg1[%c35] : memref<98xf32, #tpu.memory_space<smem>>
    %c84 = arith.constant 84 : index
    %82 = memref.load %arg1[%c84] : memref<98xf32, #tpu.memory_space<smem>>
    %c0_31 = arith.constant 0 : index
    %c80 = arith.constant 80 : index
    %83 = vector.load %arg4[%c0_31, %c80] : memref<2x358xf32, #tpu.memory_space<vmem>>, vector<1x256xf32>
    %84 = vector.broadcast %81 : f32 to vector<1x256xf32>
    %85 = arith.mulf %84, %83 : vector<1x256xf32>
    %86 = arith.addf %80, %85 : vector<1x256xf32>
    %c1_32 = arith.constant 1 : index
    %c80_33 = arith.constant 80 : index
    %87 = vector.load %arg4[%c1_32, %c80_33] : memref<2x358xf32, #tpu.memory_space<vmem>>, vector<1x256xf32>
    %88 = vector.broadcast %82 : f32 to vector<1x256xf32>
    %89 = arith.mulf %88, %87 : vector<1x256xf32>
    %90 = arith.addf %86, %89 : vector<1x256xf32>
    %c42 = arith.constant 42 : index
    %91 = memref.load %arg1[%c42] : memref<98xf32, #tpu.memory_space<smem>>
    %c91 = arith.constant 91 : index
    %92 = memref.load %arg1[%c91] : memref<98xf32, #tpu.memory_space<smem>>
    %c0_34 = arith.constant 0 : index
    %c96 = arith.constant 96 : index
    %93 = vector.load %arg4[%c0_34, %c96] : memref<2x358xf32, #tpu.memory_space<vmem>>, vector<1x256xf32>
    %94 = vector.broadcast %91 : f32 to vector<1x256xf32>
    %95 = arith.mulf %94, %93 : vector<1x256xf32>
    %96 = arith.addf %90, %95 : vector<1x256xf32>
    %c1_35 = arith.constant 1 : index
    %c96_36 = arith.constant 96 : index
    %97 = vector.load %arg4[%c1_35, %c96_36] : memref<2x358xf32, #tpu.memory_space<vmem>>, vector<1x256xf32>
    %98 = vector.broadcast %92 : f32 to vector<1x256xf32>
    %99 = arith.mulf %98, %97 : vector<1x256xf32>
    %100 = arith.addf %96, %99 : vector<1x256xf32>
    %c3_i32 = arith.constant 3 : i32
    %101 = vector.broadcast %c3_i32 : i32 to vector<1x256xi32>
    %102 = arith.cmpi sge, %28, %101 : vector<1x256xi32>
    %c19_i32 = arith.constant 19 : i32
    %103 = vector.broadcast %c19_i32 : i32 to vector<1x256xi32>
    %104 = arith.cmpi slt, %28, %103 : vector<1x256xi32>
    %105 = arith.andi %102, %104 : vector<1x256xi1>
    %cst_37 = arith.constant 0.000000e+00 : f32
    %106 = vector.broadcast %cst_37 : f32 to vector<1x256xf32>
    %107 = arith.select %105, %100, %106 : vector<1x256xi1>, vector<1x256xf32>
    %108 = arith.addf %29, %107 : vector<1x256xf32>
    %cst_38 = arith.constant 0.000000e+00 : f32
    %109 = vector.broadcast %cst_38 : f32 to vector<1x256xf32>
    %c1_39 = arith.constant 1 : index
    %110 = memref.load %arg1[%c1_39] : memref<98xf32, #tpu.memory_space<smem>>
    %c50 = arith.constant 50 : index
    %111 = memref.load %arg1[%c50] : memref<98xf32, #tpu.memory_space<smem>>
    %c0_40 = arith.constant 0 : index
    %c1_41 = arith.constant 1 : index
    %112 = vector.load %arg4[%c0_40, %c1_41] : memref<2x358xf32, #tpu.memory_space<vmem>>, vector<1x256xf32>
    %113 = vector.broadcast %110 : f32 to vector<1x256xf32>
    %114 = arith.mulf %113, %112 : vector<1x256xf32>
    %115 = arith.addf %109, %114 : vector<1x256xf32>
    %c1_42 = arith.constant 1 : index
    %c1_43 = arith.constant 1 : index
    %116 = vector.load %arg4[%c1_42, %c1_43] : memref<2x358xf32, #tpu.memory_space<vmem>>, vector<1x256xf32>
    %117 = vector.broadcast %111 : f32 to vector<1x256xf32>
    %118 = arith.mulf %117, %116 : vector<1x256xf32>
    %119 = arith.addf %115, %118 : vector<1x256xf32>
    %c8 = arith.constant 8 : index
    %120 = memref.load %arg1[%c8] : memref<98xf32, #tpu.memory_space<smem>>
    %c57 = arith.constant 57 : index
    %121 = memref.load %arg1[%c57] : memref<98xf32, #tpu.memory_space<smem>>
    %c0_44 = arith.constant 0 : index
    %c17 = arith.constant 17 : index
    %122 = vector.load %arg4[%c0_44, %c17] : memref<2x358xf32, #tpu.memory_space<vmem>>, vector<1x256xf32>
    %123 = vector.broadcast %120 : f32 to vector<1x256xf32>
    %124 = arith.mulf %123, %122 : vector<1x256xf32>
    %125 = arith.addf %119, %124 : vector<1x256xf32>
    %c1_45 = arith.constant 1 : index
    %c17_46 = arith.constant 17 : index
    %126 = vector.load %arg4[%c1_45, %c17_46] : memref<2x358xf32, #tpu.memory_space<vmem>>, vector<1x256xf32>
    %127 = vector.broadcast %121 : f32 to vector<1x256xf32>
    %128 = arith.mulf %127, %126 : vector<1x256xf32>
    %129 = arith.addf %125, %128 : vector<1x256xf32>
    %c15 = arith.constant 15 : index
    %130 = memref.load %arg1[%c15] : memref<98xf32, #tpu.memory_space<smem>>
    %c64_47 = arith.constant 64 : index
    %131 = memref.load %arg1[%c64_47] : memref<98xf32, #tpu.memory_space<smem>>
    %c0_48 = arith.constant 0 : index
    %c33 = arith.constant 33 : index
    %132 = vector.load %arg4[%c0_48, %c33] : memref<2x358xf32, #tpu.memory_space<vmem>>, vector<1x256xf32>
    %133 = vector.broadcast %130 : f32 to vector<1x256xf32>
    %134 = arith.mulf %133, %132 : vector<1x256xf32>
    %135 = arith.addf %129, %134 : vector<1x256xf32>
    %c1_49 = arith.constant 1 : index
    %c33_50 = arith.constant 33 : index
    %136 = vector.load %arg4[%c1_49, %c33_50] : memref<2x358xf32, #tpu.memory_space<vmem>>, vector<1x256xf32>
    %137 = vector.broadcast %131 : f32 to vector<1x256xf32>
    %138 = arith.mulf %137, %136 : vector<1x256xf32>
    %139 = arith.addf %135, %138 : vector<1x256xf32>
    %c22 = arith.constant 22 : index
    %140 = memref.load %arg1[%c22] : memref<98xf32, #tpu.memory_space<smem>>
    %c71 = arith.constant 71 : index
    %141 = memref.load %arg1[%c71] : memref<98xf32, #tpu.memory_space<smem>>
    %c0_51 = arith.constant 0 : index
    %c49_52 = arith.constant 49 : index
    %142 = vector.load %arg4[%c0_51, %c49_52] : memref<2x358xf32, #tpu.memory_space<vmem>>, vector<1x256xf32>
    %143 = vector.broadcast %140 : f32 to vector<1x256xf32>
    %144 = arith.mulf %143, %142 : vector<1x256xf32>
    %145 = arith.addf %139, %144 : vector<1x256xf32>
    %c1_53 = arith.constant 1 : index
    %c49_54 = arith.constant 49 : index
    %146 = vector.load %arg4[%c1_53, %c49_54] : memref<2x358xf32, #tpu.memory_space<vmem>>, vector<1x256xf32>
    %147 = vector.broadcast %141 : f32 to vector<1x256xf32>
    %148 = arith.mulf %147, %146 : vector<1x256xf32>
    %149 = arith.addf %145, %148 : vector<1x256xf32>
    %c29 = arith.constant 29 : index
    %150 = memref.load %arg1[%c29] : memref<98xf32, #tpu.memory_space<smem>>
    %c78 = arith.constant 78 : index
    %151 = memref.load %arg1[%c78] : memref<98xf32, #tpu.memory_space<smem>>
    %c0_55 = arith.constant 0 : index
    %c65 = arith.constant 65 : index
    %152 = vector.load %arg4[%c0_55, %c65] : memref<2x358xf32, #tpu.memory_space<vmem>>, vector<1x256xf32>
    %153 = vector.broadcast %150 : f32 to vector<1x256xf32>
    %154 = arith.mulf %153, %152 : vector<1x256xf32>
    %155 = arith.addf %149, %154 : vector<1x256xf32>
    %c1_56 = arith.constant 1 : index
    %c65_57 = arith.constant 65 : index
    %156 = vector.load %arg4[%c1_56, %c65_57] : memref<2x358xf32, #tpu.memory_space<vmem>>, vector<1x256xf32>
    %157 = vector.broadcast %151 : f32 to vector<1x256xf32>
    %158 = arith.mulf %157, %156 : vector<1x256xf32>
    %159 = arith.addf %155, %158 : vector<1x256xf32>
    %c36 = arith.constant 36 : index
    %160 = memref.load %arg1[%c36] : memref<98xf32, #tpu.memory_space<smem>>
    %c85 = arith.constant 85 : index
    %161 = memref.load %arg1[%c85] : memref<98xf32, #tpu.memory_space<smem>>
    %c0_58 = arith.constant 0 : index
    %c81 = arith.constant 81 : index
    %162 = vector.load %arg4[%c0_58, %c81] : memref<2x358xf32, #tpu.memory_space<vmem>>, vector<1x256xf32>
    %163 = vector.broadcast %160 : f32 to vector<1x256xf32>
    %164 = arith.mulf %163, %162 : vector<1x256xf32>
    %165 = arith.addf %159, %164 : vector<1x256xf32>
    %c1_59 = arith.constant 1 : index
    %c81_60 = arith.constant 81 : index
    %166 = vector.load %arg4[%c1_59, %c81_60] : memref<2x358xf32, #tpu.memory_space<vmem>>, vector<1x256xf32>
    %167 = vector.broadcast %161 : f32 to vector<1x256xf32>
    %168 = arith.mulf %167, %166 : vector<1x256xf32>
    %169 = arith.addf %165, %168 : vector<1x256xf32>
    %c43 = arith.constant 43 : index
    %170 = memref.load %arg1[%c43] : memref<98xf32, #tpu.memory_space<smem>>
    %c92 = arith.constant 92 : index
    %171 = memref.load %arg1[%c92] : memref<98xf32, #tpu.memory_space<smem>>
    %c0_61 = arith.constant 0 : index
    %c97 = arith.constant 97 : index
    %172 = vector.load %arg4[%c0_61, %c97] : memref<2x358xf32, #tpu.memory_space<vmem>>, vector<1x256xf32>
    %173 = vector.broadcast %170 : f32 to vector<1x256xf32>
    %174 = arith.mulf %173, %172 : vector<1x256xf32>
    %175 = arith.addf %169, %174 : vector<1x256xf32>
    %c1_62 = arith.constant 1 : index
    %c97_63 = arith.constant 97 : index
    %176 = vector.load %arg4[%c1_62, %c97_63] : memref<2x358xf32, #tpu.memory_space<vmem>>, vector<1x256xf32>
    %177 = vector.broadcast %171 : f32 to vector<1x256xf32>
    %178 = arith.mulf %177, %176 : vector<1x256xf32>
    %179 = arith.addf %175, %178 : vector<1x256xf32>
    %c2_i32 = arith.constant 2 : i32
    %180 = vector.broadcast %c2_i32 : i32 to vector<1x256xi32>
    %181 = arith.cmpi sge, %28, %180 : vector<1x256xi32>
    %c18_i32 = arith.constant 18 : i32
    %182 = vector.broadcast %c18_i32 : i32 to vector<1x256xi32>
    %183 = arith.cmpi slt, %28, %182 : vector<1x256xi32>
    %184 = arith.andi %181, %183 : vector<1x256xi1>
    %cst_64 = arith.constant 0.000000e+00 : f32
    %185 = vector.broadcast %cst_64 : f32 to vector<1x256xf32>
    %186 = arith.select %184, %179, %185 : vector<1x256xi1>, vector<1x256xf32>
    %187 = arith.addf %108, %186 : vector<1x256xf32>
    %cst_65 = arith.constant 0.000000e+00 : f32
    %188 = vector.broadcast %cst_65 : f32 to vector<1x256xf32>
    %c2 = arith.constant 2 : index
    %189 = memref.load %arg1[%c2] : memref<98xf32, #tpu.memory_space<smem>>
    %c51_66 = arith.constant 51 : index
    %190 = memref.load %arg1[%c51_66] : memref<98xf32, #tpu.memory_space<smem>>
    %c0_67 = arith.constant 0 : index
    %c2_68 = arith.constant 2 : index
    %191 = vector.load %arg4[%c0_67, %c2_68] : memref<2x358xf32, #tpu.memory_space<vmem>>, vector<1x256xf32>
    %192 = vector.broadcast %189 : f32 to vector<1x256xf32>
    %193 = arith.mulf %192, %191 : vector<1x256xf32>
    %194 = arith.addf %188, %193 : vector<1x256xf32>
    %c1_69 = arith.constant 1 : index
    %c2_70 = arith.constant 2 : index
    %195 = vector.load %arg4[%c1_69, %c2_70] : memref<2x358xf32, #tpu.memory_space<vmem>>, vector<1x256xf32>
    %196 = vector.broadcast %190 : f32 to vector<1x256xf32>
    %197 = arith.mulf %196, %195 : vector<1x256xf32>
    %198 = arith.addf %194, %197 : vector<1x256xf32>
    %c9 = arith.constant 9 : index
    %199 = memref.load %arg1[%c9] : memref<98xf32, #tpu.memory_space<smem>>
    %c58 = arith.constant 58 : index
    %200 = memref.load %arg1[%c58] : memref<98xf32, #tpu.memory_space<smem>>
    %c0_71 = arith.constant 0 : index
    %c18 = arith.constant 18 : index
    %201 = vector.load %arg4[%c0_71, %c18] : memref<2x358xf32, #tpu.memory_space<vmem>>, vector<1x256xf32>
    %202 = vector.broadcast %199 : f32 to vector<1x256xf32>
    %203 = arith.mulf %202, %201 : vector<1x256xf32>
    %204 = arith.addf %198, %203 : vector<1x256xf32>
    %c1_72 = arith.constant 1 : index
    %c18_73 = arith.constant 18 : index
    %205 = vector.load %arg4[%c1_72, %c18_73] : memref<2x358xf32, #tpu.memory_space<vmem>>, vector<1x256xf32>
    %206 = vector.broadcast %200 : f32 to vector<1x256xf32>
    %207 = arith.mulf %206, %205 : vector<1x256xf32>
    %208 = arith.addf %204, %207 : vector<1x256xf32>
    %c16_74 = arith.constant 16 : index
    %209 = memref.load %arg1[%c16_74] : memref<98xf32, #tpu.memory_space<smem>>
    %c65_75 = arith.constant 65 : index
    %210 = memref.load %arg1[%c65_75] : memref<98xf32, #tpu.memory_space<smem>>
    %c0_76 = arith.constant 0 : index
    %c34 = arith.constant 34 : index
    %211 = vector.load %arg4[%c0_76, %c34] : memref<2x358xf32, #tpu.memory_space<vmem>>, vector<1x256xf32>
    %212 = vector.broadcast %209 : f32 to vector<1x256xf32>
    %213 = arith.mulf %212, %211 : vector<1x256xf32>
    %214 = arith.addf %208, %213 : vector<1x256xf32>
    %c1_77 = arith.constant 1 : index
    %c34_78 = arith.constant 34 : index
    %215 = vector.load %arg4[%c1_77, %c34_78] : memref<2x358xf32, #tpu.memory_space<vmem>>, vector<1x256xf32>
    %216 = vector.broadcast %210 : f32 to vector<1x256xf32>
    %217 = arith.mulf %216, %215 : vector<1x256xf32>
    %218 = arith.addf %214, %217 : vector<1x256xf32>
    %c23 = arith.constant 23 : index
    %219 = memref.load %arg1[%c23] : memref<98xf32, #tpu.memory_space<smem>>
    %c72 = arith.constant 72 : index
    %220 = memref.load %arg1[%c72] : memref<98xf32, #tpu.memory_space<smem>>
    %c0_79 = arith.constant 0 : index
    %c50_80 = arith.constant 50 : index
    %221 = vector.load %arg4[%c0_79, %c50_80] : memref<2x358xf32, #tpu.memory_space<vmem>>, vector<1x256xf32>
    %222 = vector.broadcast %219 : f32 to vector<1x256xf32>
    %223 = arith.mulf %222, %221 : vector<1x256xf32>
    %224 = arith.addf %218, %223 : vector<1x256xf32>
    %c1_81 = arith.constant 1 : index
    %c50_82 = arith.constant 50 : index
    %225 = vector.load %arg4[%c1_81, %c50_82] : memref<2x358xf32, #tpu.memory_space<vmem>>, vector<1x256xf32>
    %226 = vector.broadcast %220 : f32 to vector<1x256xf32>
    %227 = arith.mulf %226, %225 : vector<1x256xf32>
    %228 = arith.addf %224, %227 : vector<1x256xf32>
    %c30 = arith.constant 30 : index
    %229 = memref.load %arg1[%c30] : memref<98xf32, #tpu.memory_space<smem>>
    %c79 = arith.constant 79 : index
    %230 = memref.load %arg1[%c79] : memref<98xf32, #tpu.memory_space<smem>>
    %c0_83 = arith.constant 0 : index
    %c66 = arith.constant 66 : index
    %231 = vector.load %arg4[%c0_83, %c66] : memref<2x358xf32, #tpu.memory_space<vmem>>, vector<1x256xf32>
    %232 = vector.broadcast %229 : f32 to vector<1x256xf32>
    %233 = arith.mulf %232, %231 : vector<1x256xf32>
    %234 = arith.addf %228, %233 : vector<1x256xf32>
    %c1_84 = arith.constant 1 : index
    %c66_85 = arith.constant 66 : index
    %235 = vector.load %arg4[%c1_84, %c66_85] : memref<2x358xf32, #tpu.memory_space<vmem>>, vector<1x256xf32>
    %236 = vector.broadcast %230 : f32 to vector<1x256xf32>
    %237 = arith.mulf %236, %235 : vector<1x256xf32>
    %238 = arith.addf %234, %237 : vector<1x256xf32>
    %c37 = arith.constant 37 : index
    %239 = memref.load %arg1[%c37] : memref<98xf32, #tpu.memory_space<smem>>
    %c86 = arith.constant 86 : index
    %240 = memref.load %arg1[%c86] : memref<98xf32, #tpu.memory_space<smem>>
    %c0_86 = arith.constant 0 : index
    %c82 = arith.constant 82 : index
    %241 = vector.load %arg4[%c0_86, %c82] : memref<2x358xf32, #tpu.memory_space<vmem>>, vector<1x256xf32>
    %242 = vector.broadcast %239 : f32 to vector<1x256xf32>
    %243 = arith.mulf %242, %241 : vector<1x256xf32>
    %244 = arith.addf %238, %243 : vector<1x256xf32>
    %c1_87 = arith.constant 1 : index
    %c82_88 = arith.constant 82 : index
    %245 = vector.load %arg4[%c1_87, %c82_88] : memref<2x358xf32, #tpu.memory_space<vmem>>, vector<1x256xf32>
    %246 = vector.broadcast %240 : f32 to vector<1x256xf32>
    %247 = arith.mulf %246, %245 : vector<1x256xf32>
    %248 = arith.addf %244, %247 : vector<1x256xf32>
    %c44 = arith.constant 44 : index
    %249 = memref.load %arg1[%c44] : memref<98xf32, #tpu.memory_space<smem>>
    %c93 = arith.constant 93 : index
    %250 = memref.load %arg1[%c93] : memref<98xf32, #tpu.memory_space<smem>>
    %c0_89 = arith.constant 0 : index
    %c98 = arith.constant 98 : index
    %251 = vector.load %arg4[%c0_89, %c98] : memref<2x358xf32, #tpu.memory_space<vmem>>, vector<1x256xf32>
    %252 = vector.broadcast %249 : f32 to vector<1x256xf32>
    %253 = arith.mulf %252, %251 : vector<1x256xf32>
    %254 = arith.addf %248, %253 : vector<1x256xf32>
    %c1_90 = arith.constant 1 : index
    %c98_91 = arith.constant 98 : index
    %255 = vector.load %arg4[%c1_90, %c98_91] : memref<2x358xf32, #tpu.memory_space<vmem>>, vector<1x256xf32>
    %256 = vector.broadcast %250 : f32 to vector<1x256xf32>
    %257 = arith.mulf %256, %255 : vector<1x256xf32>
    %258 = arith.addf %254, %257 : vector<1x256xf32>
    %c1_i32_92 = arith.constant 1 : i32
    %259 = vector.broadcast %c1_i32_92 : i32 to vector<1x256xi32>
    %260 = arith.cmpi sge, %28, %259 : vector<1x256xi32>
    %c17_i32 = arith.constant 17 : i32
    %261 = vector.broadcast %c17_i32 : i32 to vector<1x256xi32>
    %262 = arith.cmpi slt, %28, %261 : vector<1x256xi32>
    %263 = arith.andi %260, %262 : vector<1x256xi1>
    %cst_93 = arith.constant 0.000000e+00 : f32
    %264 = vector.broadcast %cst_93 : f32 to vector<1x256xf32>
    %265 = arith.select %263, %258, %264 : vector<1x256xi1>, vector<1x256xf32>
    %266 = arith.addf %187, %265 : vector<1x256xf32>
    %cst_94 = arith.constant 0.000000e+00 : f32
    %267 = vector.broadcast %cst_94 : f32 to vector<1x256xf32>
    %c3 = arith.constant 3 : index
    %268 = memref.load %arg1[%c3] : memref<98xf32, #tpu.memory_space<smem>>
    %c52 = arith.constant 52 : index
    %269 = memref.load %arg1[%c52] : memref<98xf32, #tpu.memory_space<smem>>
    %c0_95 = arith.constant 0 : index
    %c3_96 = arith.constant 3 : index
    %270 = vector.load %arg4[%c0_95, %c3_96] : memref<2x358xf32, #tpu.memory_space<vmem>>, vector<1x256xf32>
    %271 = vector.broadcast %268 : f32 to vector<1x256xf32>
    %272 = arith.mulf %271, %270 : vector<1x256xf32>
    %273 = arith.addf %267, %272 : vector<1x256xf32>
    %c1_97 = arith.constant 1 : index
    %c3_98 = arith.constant 3 : index
    %274 = vector.load %arg4[%c1_97, %c3_98] : memref<2x358xf32, #tpu.memory_space<vmem>>, vector<1x256xf32>
    %275 = vector.broadcast %269 : f32 to vector<1x256xf32>
    %276 = arith.mulf %275, %274 : vector<1x256xf32>
    %277 = arith.addf %273, %276 : vector<1x256xf32>
    %c10 = arith.constant 10 : index
    %278 = memref.load %arg1[%c10] : memref<98xf32, #tpu.memory_space<smem>>
    %c59 = arith.constant 59 : index
    %279 = memref.load %arg1[%c59] : memref<98xf32, #tpu.memory_space<smem>>
    %c0_99 = arith.constant 0 : index
    %c19 = arith.constant 19 : index
    %280 = vector.load %arg4[%c0_99, %c19] : memref<2x358xf32, #tpu.memory_space<vmem>>, vector<1x256xf32>
    %281 = vector.broadcast %278 : f32 to vector<1x256xf32>
    %282 = arith.mulf %281, %280 : vector<1x256xf32>
    %283 = arith.addf %277, %282 : vector<1x256xf32>
    %c1_100 = arith.constant 1 : index
    %c19_101 = arith.constant 19 : index
    %284 = vector.load %arg4[%c1_100, %c19_101] : memref<2x358xf32, #tpu.memory_space<vmem>>, vector<1x256xf32>
    %285 = vector.broadcast %279 : f32 to vector<1x256xf32>
    %286 = arith.mulf %285, %284 : vector<1x256xf32>
    %287 = arith.addf %283, %286 : vector<1x256xf32>
    %c17_102 = arith.constant 17 : index
    %288 = memref.load %arg1[%c17_102] : memref<98xf32, #tpu.memory_space<smem>>
    %c66_103 = arith.constant 66 : index
    %289 = memref.load %arg1[%c66_103] : memref<98xf32, #tpu.memory_space<smem>>
    %c0_104 = arith.constant 0 : index
    %c35_105 = arith.constant 35 : index
    %290 = vector.load %arg4[%c0_104, %c35_105] : memref<2x358xf32, #tpu.memory_space<vmem>>, vector<1x256xf32>
    %291 = vector.broadcast %288 : f32 to vector<1x256xf32>
    %292 = arith.mulf %291, %290 : vector<1x256xf32>
    %293 = arith.addf %287, %292 : vector<1x256xf32>
    %c1_106 = arith.constant 1 : index
    %c35_107 = arith.constant 35 : index
    %294 = vector.load %arg4[%c1_106, %c35_107] : memref<2x358xf32, #tpu.memory_space<vmem>>, vector<1x256xf32>
    %295 = vector.broadcast %289 : f32 to vector<1x256xf32>
    %296 = arith.mulf %295, %294 : vector<1x256xf32>
    %297 = arith.addf %293, %296 : vector<1x256xf32>
    %c24 = arith.constant 24 : index
    %298 = memref.load %arg1[%c24] : memref<98xf32, #tpu.memory_space<smem>>
    %c73 = arith.constant 73 : index
    %299 = memref.load %arg1[%c73] : memref<98xf32, #tpu.memory_space<smem>>
    %c0_108 = arith.constant 0 : index
    %c51_109 = arith.constant 51 : index
    %300 = vector.load %arg4[%c0_108, %c51_109] : memref<2x358xf32, #tpu.memory_space<vmem>>, vector<1x256xf32>
    %301 = vector.broadcast %298 : f32 to vector<1x256xf32>
    %302 = arith.mulf %301, %300 : vector<1x256xf32>
    %303 = arith.addf %297, %302 : vector<1x256xf32>
    %c1_110 = arith.constant 1 : index
    %c51_111 = arith.constant 51 : index
    %304 = vector.load %arg4[%c1_110, %c51_111] : memref<2x358xf32, #tpu.memory_space<vmem>>, vector<1x256xf32>
    %305 = vector.broadcast %299 : f32 to vector<1x256xf32>
    %306 = arith.mulf %305, %304 : vector<1x256xf32>
    %307 = arith.addf %303, %306 : vector<1x256xf32>
    %c31 = arith.constant 31 : index
    %308 = memref.load %arg1[%c31] : memref<98xf32, #tpu.memory_space<smem>>
    %c80_112 = arith.constant 80 : index
    %309 = memref.load %arg1[%c80_112] : memref<98xf32, #tpu.memory_space<smem>>
    %c0_113 = arith.constant 0 : index
    %c67 = arith.constant 67 : index
    %310 = vector.load %arg4[%c0_113, %c67] : memref<2x358xf32, #tpu.memory_space<vmem>>, vector<1x256xf32>
    %311 = vector.broadcast %308 : f32 to vector<1x256xf32>
    %312 = arith.mulf %311, %310 : vector<1x256xf32>
    %313 = arith.addf %307, %312 : vector<1x256xf32>
    %c1_114 = arith.constant 1 : index
    %c67_115 = arith.constant 67 : index
    %314 = vector.load %arg4[%c1_114, %c67_115] : memref<2x358xf32, #tpu.memory_space<vmem>>, vector<1x256xf32>
    %315 = vector.broadcast %309 : f32 to vector<1x256xf32>
    %316 = arith.mulf %315, %314 : vector<1x256xf32>
    %317 = arith.addf %313, %316 : vector<1x256xf32>
    %c38 = arith.constant 38 : index
    %318 = memref.load %arg1[%c38] : memref<98xf32, #tpu.memory_space<smem>>
    %c87 = arith.constant 87 : index
    %319 = memref.load %arg1[%c87] : memref<98xf32, #tpu.memory_space<smem>>
    %c0_116 = arith.constant 0 : index
    %c83 = arith.constant 83 : index
    %320 = vector.load %arg4[%c0_116, %c83] : memref<2x358xf32, #tpu.memory_space<vmem>>, vector<1x256xf32>
    %321 = vector.broadcast %318 : f32 to vector<1x256xf32>
    %322 = arith.mulf %321, %320 : vector<1x256xf32>
    %323 = arith.addf %317, %322 : vector<1x256xf32>
    %c1_117 = arith.constant 1 : index
    %c83_118 = arith.constant 83 : index
    %324 = vector.load %arg4[%c1_117, %c83_118] : memref<2x358xf32, #tpu.memory_space<vmem>>, vector<1x256xf32>
    %325 = vector.broadcast %319 : f32 to vector<1x256xf32>
    %326 = arith.mulf %325, %324 : vector<1x256xf32>
    %327 = arith.addf %323, %326 : vector<1x256xf32>
    %c45 = arith.constant 45 : index
    %328 = memref.load %arg1[%c45] : memref<98xf32, #tpu.memory_space<smem>>
    %c94 = arith.constant 94 : index
    %329 = memref.load %arg1[%c94] : memref<98xf32, #tpu.memory_space<smem>>
    %c0_119 = arith.constant 0 : index
    %c99 = arith.constant 99 : index
    %330 = vector.load %arg4[%c0_119, %c99] : memref<2x358xf32, #tpu.memory_space<vmem>>, vector<1x256xf32>
    %331 = vector.broadcast %328 : f32 to vector<1x256xf32>
    %332 = arith.mulf %331, %330 : vector<1x256xf32>
    %333 = arith.addf %327, %332 : vector<1x256xf32>
    %c1_120 = arith.constant 1 : index
    %c99_121 = arith.constant 99 : index
    %334 = vector.load %arg4[%c1_120, %c99_121] : memref<2x358xf32, #tpu.memory_space<vmem>>, vector<1x256xf32>
    %335 = vector.broadcast %329 : f32 to vector<1x256xf32>
    %336 = arith.mulf %335, %334 : vector<1x256xf32>
    %337 = arith.addf %333, %336 : vector<1x256xf32>
    %c0_i32_122 = arith.constant 0 : i32
    %338 = vector.broadcast %c0_i32_122 : i32 to vector<1x256xi32>
    %339 = arith.cmpi sge, %28, %338 : vector<1x256xi32>
    %c16_i32_123 = arith.constant 16 : i32
    %340 = vector.broadcast %c16_i32_123 : i32 to vector<1x256xi32>
    %341 = arith.cmpi slt, %28, %340 : vector<1x256xi32>
    %342 = arith.andi %339, %341 : vector<1x256xi1>
    %cst_124 = arith.constant 0.000000e+00 : f32
    %343 = vector.broadcast %cst_124 : f32 to vector<1x256xf32>
    %344 = arith.select %342, %337, %343 : vector<1x256xi1>, vector<1x256xf32>
    %345 = arith.addf %266, %344 : vector<1x256xf32>
    %cst_125 = arith.constant 0.000000e+00 : f32
    %346 = vector.broadcast %cst_125 : f32 to vector<1x256xf32>
    %c4 = arith.constant 4 : index
    %347 = memref.load %arg1[%c4] : memref<98xf32, #tpu.memory_space<smem>>
    %c53 = arith.constant 53 : index
    %348 = memref.load %arg1[%c53] : memref<98xf32, #tpu.memory_space<smem>>
    %c0_126 = arith.constant 0 : index
    %c4_127 = arith.constant 4 : index
    %349 = vector.load %arg4[%c0_126, %c4_127] : memref<2x358xf32, #tpu.memory_space<vmem>>, vector<1x256xf32>
    %350 = vector.broadcast %347 : f32 to vector<1x256xf32>
    %351 = arith.mulf %350, %349 : vector<1x256xf32>
    %352 = arith.addf %346, %351 : vector<1x256xf32>
    %c1_128 = arith.constant 1 : index
    %c4_129 = arith.constant 4 : index
    %353 = vector.load %arg4[%c1_128, %c4_129] : memref<2x358xf32, #tpu.memory_space<vmem>>, vector<1x256xf32>
    %354 = vector.broadcast %348 : f32 to vector<1x256xf32>
    %355 = arith.mulf %354, %353 : vector<1x256xf32>
    %356 = arith.addf %352, %355 : vector<1x256xf32>
    %c11 = arith.constant 11 : index
    %357 = memref.load %arg1[%c11] : memref<98xf32, #tpu.memory_space<smem>>
    %c60 = arith.constant 60 : index
    %358 = memref.load %arg1[%c60] : memref<98xf32, #tpu.memory_space<smem>>
    %c0_130 = arith.constant 0 : index
    %c20 = arith.constant 20 : index
    %359 = vector.load %arg4[%c0_130, %c20] : memref<2x358xf32, #tpu.memory_space<vmem>>, vector<1x256xf32>
    %360 = vector.broadcast %357 : f32 to vector<1x256xf32>
    %361 = arith.mulf %360, %359 : vector<1x256xf32>
    %362 = arith.addf %356, %361 : vector<1x256xf32>
    %c1_131 = arith.constant 1 : index
    %c20_132 = arith.constant 20 : index
    %363 = vector.load %arg4[%c1_131, %c20_132] : memref<2x358xf32, #tpu.memory_space<vmem>>, vector<1x256xf32>
    %364 = vector.broadcast %358 : f32 to vector<1x256xf32>
    %365 = arith.mulf %364, %363 : vector<1x256xf32>
    %366 = arith.addf %362, %365 : vector<1x256xf32>
    %c18_133 = arith.constant 18 : index
    %367 = memref.load %arg1[%c18_133] : memref<98xf32, #tpu.memory_space<smem>>
    %c67_134 = arith.constant 67 : index
    %368 = memref.load %arg1[%c67_134] : memref<98xf32, #tpu.memory_space<smem>>
    %c0_135 = arith.constant 0 : index
    %c36_136 = arith.constant 36 : index
    %369 = vector.load %arg4[%c0_135, %c36_136] : memref<2x358xf32, #tpu.memory_space<vmem>>, vector<1x256xf32>
    %370 = vector.broadcast %367 : f32 to vector<1x256xf32>
    %371 = arith.mulf %370, %369 : vector<1x256xf32>
    %372 = arith.addf %366, %371 : vector<1x256xf32>
    %c1_137 = arith.constant 1 : index
    %c36_138 = arith.constant 36 : index
    %373 = vector.load %arg4[%c1_137, %c36_138] : memref<2x358xf32, #tpu.memory_space<vmem>>, vector<1x256xf32>
    %374 = vector.broadcast %368 : f32 to vector<1x256xf32>
    %375 = arith.mulf %374, %373 : vector<1x256xf32>
    %376 = arith.addf %372, %375 : vector<1x256xf32>
    %c25 = arith.constant 25 : index
    %377 = memref.load %arg1[%c25] : memref<98xf32, #tpu.memory_space<smem>>
    %c74 = arith.constant 74 : index
    %378 = memref.load %arg1[%c74] : memref<98xf32, #tpu.memory_space<smem>>
    %c0_139 = arith.constant 0 : index
    %c52_140 = arith.constant 52 : index
    %379 = vector.load %arg4[%c0_139, %c52_140] : memref<2x358xf32, #tpu.memory_space<vmem>>, vector<1x256xf32>
    %380 = vector.broadcast %377 : f32 to vector<1x256xf32>
    %381 = arith.mulf %380, %379 : vector<1x256xf32>
    %382 = arith.addf %376, %381 : vector<1x256xf32>
    %c1_141 = arith.constant 1 : index
    %c52_142 = arith.constant 52 : index
    %383 = vector.load %arg4[%c1_141, %c52_142] : memref<2x358xf32, #tpu.memory_space<vmem>>, vector<1x256xf32>
    %384 = vector.broadcast %378 : f32 to vector<1x256xf32>
    %385 = arith.mulf %384, %383 : vector<1x256xf32>
    %386 = arith.addf %382, %385 : vector<1x256xf32>
    %c32_143 = arith.constant 32 : index
    %387 = memref.load %arg1[%c32_143] : memref<98xf32, #tpu.memory_space<smem>>
    %c81_144 = arith.constant 81 : index
    %388 = memref.load %arg1[%c81_144] : memref<98xf32, #tpu.memory_space<smem>>
    %c0_145 = arith.constant 0 : index
    %c68 = arith.constant 68 : index
    %389 = vector.load %arg4[%c0_145, %c68] : memref<2x358xf32, #tpu.memory_space<vmem>>, vector<1x256xf32>
    %390 = vector.broadcast %387 : f32 to vector<1x256xf32>
    %391 = arith.mulf %390, %389 : vector<1x256xf32>
    %392 = arith.addf %386, %391 : vector<1x256xf32>
    %c1_146 = arith.constant 1 : index
    %c68_147 = arith.constant 68 : index
    %393 = vector.load %arg4[%c1_146, %c68_147] : memref<2x358xf32, #tpu.memory_space<vmem>>, vector<1x256xf32>
    %394 = vector.broadcast %388 : f32 to vector<1x256xf32>
    %395 = arith.mulf %394, %393 : vector<1x256xf32>
    %396 = arith.addf %392, %395 : vector<1x256xf32>
    %c39 = arith.constant 39 : index
    %397 = memref.load %arg1[%c39] : memref<98xf32, #tpu.memory_space<smem>>
    %c88 = arith.constant 88 : index
    %398 = memref.load %arg1[%c88] : memref<98xf32, #tpu.memory_space<smem>>
    %c0_148 = arith.constant 0 : index
    %c84_149 = arith.constant 84 : index
    %399 = vector.load %arg4[%c0_148, %c84_149] : memref<2x358xf32, #tpu.memory_space<vmem>>, vector<1x256xf32>
    %400 = vector.broadcast %397 : f32 to vector<1x256xf32>
    %401 = arith.mulf %400, %399 : vector<1x256xf32>
    %402 = arith.addf %396, %401 : vector<1x256xf32>
    %c1_150 = arith.constant 1 : index
    %c84_151 = arith.constant 84 : index
    %403 = vector.load %arg4[%c1_150, %c84_151] : memref<2x358xf32, #tpu.memory_space<vmem>>, vector<1x256xf32>
    %404 = vector.broadcast %398 : f32 to vector<1x256xf32>
    %405 = arith.mulf %404, %403 : vector<1x256xf32>
    %406 = arith.addf %402, %405 : vector<1x256xf32>
    %c46 = arith.constant 46 : index
    %407 = memref.load %arg1[%c46] : memref<98xf32, #tpu.memory_space<smem>>
    %c95 = arith.constant 95 : index
    %408 = memref.load %arg1[%c95] : memref<98xf32, #tpu.memory_space<smem>>
    %c0_152 = arith.constant 0 : index
    %c100 = arith.constant 100 : index
    %409 = vector.load %arg4[%c0_152, %c100] : memref<2x358xf32, #tpu.memory_space<vmem>>, vector<1x256xf32>
    %410 = vector.broadcast %407 : f32 to vector<1x256xf32>
    %411 = arith.mulf %410, %409 : vector<1x256xf32>
    %412 = arith.addf %406, %411 : vector<1x256xf32>
    %c1_153 = arith.constant 1 : index
    %c100_154 = arith.constant 100 : index
    %413 = vector.load %arg4[%c1_153, %c100_154] : memref<2x358xf32, #tpu.memory_space<vmem>>, vector<1x256xf32>
    %414 = vector.broadcast %408 : f32 to vector<1x256xf32>
    %415 = arith.mulf %414, %413 : vector<1x256xf32>
    %416 = arith.addf %412, %415 : vector<1x256xf32>
    %c-1_i32 = arith.constant -1 : i32
    %417 = vector.broadcast %c-1_i32 : i32 to vector<1x256xi32>
    %418 = arith.cmpi sge, %28, %417 : vector<1x256xi32>
    %c15_i32 = arith.constant 15 : i32
    %419 = vector.broadcast %c15_i32 : i32 to vector<1x256xi32>
    %420 = arith.cmpi slt, %28, %419 : vector<1x256xi32>
    %421 = arith.andi %418, %420 : vector<1x256xi1>
    %cst_155 = arith.constant 0.000000e+00 : f32
    %422 = vector.broadcast %cst_155 : f32 to vector<1x256xf32>
    %423 = arith.select %421, %416, %422 : vector<1x256xi1>, vector<1x256xf32>
    %424 = arith.addf %345, %423 : vector<1x256xf32>
    %cst_156 = arith.constant 0.000000e+00 : f32
    %425 = vector.broadcast %cst_156 : f32 to vector<1x256xf32>
    %c5 = arith.constant 5 : index
    %426 = memref.load %arg1[%c5] : memref<98xf32, #tpu.memory_space<smem>>
    %c54 = arith.constant 54 : index
    %427 = memref.load %arg1[%c54] : memref<98xf32, #tpu.memory_space<smem>>
    %c0_157 = arith.constant 0 : index
    %c5_158 = arith.constant 5 : index
    %428 = vector.load %arg4[%c0_157, %c5_158] : memref<2x358xf32, #tpu.memory_space<vmem>>, vector<1x256xf32>
    %429 = vector.broadcast %426 : f32 to vector<1x256xf32>
    %430 = arith.mulf %429, %428 : vector<1x256xf32>
    %431 = arith.addf %425, %430 : vector<1x256xf32>
    %c1_159 = arith.constant 1 : index
    %c5_160 = arith.constant 5 : index
    %432 = vector.load %arg4[%c1_159, %c5_160] : memref<2x358xf32, #tpu.memory_space<vmem>>, vector<1x256xf32>
    %433 = vector.broadcast %427 : f32 to vector<1x256xf32>
    %434 = arith.mulf %433, %432 : vector<1x256xf32>
    %435 = arith.addf %431, %434 : vector<1x256xf32>
    %c12 = arith.constant 12 : index
    %436 = memref.load %arg1[%c12] : memref<98xf32, #tpu.memory_space<smem>>
    %c61 = arith.constant 61 : index
    %437 = memref.load %arg1[%c61] : memref<98xf32, #tpu.memory_space<smem>>
    %c0_161 = arith.constant 0 : index
    %c21_162 = arith.constant 21 : index
    %438 = vector.load %arg4[%c0_161, %c21_162] : memref<2x358xf32, #tpu.memory_space<vmem>>, vector<1x256xf32>
    %439 = vector.broadcast %436 : f32 to vector<1x256xf32>
    %440 = arith.mulf %439, %438 : vector<1x256xf32>
    %441 = arith.addf %435, %440 : vector<1x256xf32>
    %c1_163 = arith.constant 1 : index
    %c21_164 = arith.constant 21 : index
    %442 = vector.load %arg4[%c1_163, %c21_164] : memref<2x358xf32, #tpu.memory_space<vmem>>, vector<1x256xf32>
    %443 = vector.broadcast %437 : f32 to vector<1x256xf32>
    %444 = arith.mulf %443, %442 : vector<1x256xf32>
    %445 = arith.addf %441, %444 : vector<1x256xf32>
    %c19_165 = arith.constant 19 : index
    %446 = memref.load %arg1[%c19_165] : memref<98xf32, #tpu.memory_space<smem>>
    %c68_166 = arith.constant 68 : index
    %447 = memref.load %arg1[%c68_166] : memref<98xf32, #tpu.memory_space<smem>>
    %c0_167 = arith.constant 0 : index
    %c37_168 = arith.constant 37 : index
    %448 = vector.load %arg4[%c0_167, %c37_168] : memref<2x358xf32, #tpu.memory_space<vmem>>, vector<1x256xf32>
    %449 = vector.broadcast %446 : f32 to vector<1x256xf32>
    %450 = arith.mulf %449, %448 : vector<1x256xf32>
    %451 = arith.addf %445, %450 : vector<1x256xf32>
    %c1_169 = arith.constant 1 : index
    %c37_170 = arith.constant 37 : index
    %452 = vector.load %arg4[%c1_169, %c37_170] : memref<2x358xf32, #tpu.memory_space<vmem>>, vector<1x256xf32>
    %453 = vector.broadcast %447 : f32 to vector<1x256xf32>
    %454 = arith.mulf %453, %452 : vector<1x256xf32>
    %455 = arith.addf %451, %454 : vector<1x256xf32>
    %c26 = arith.constant 26 : index
    %456 = memref.load %arg1[%c26] : memref<98xf32, #tpu.memory_space<smem>>
    %c75 = arith.constant 75 : index
    %457 = memref.load %arg1[%c75] : memref<98xf32, #tpu.memory_space<smem>>
    %c0_171 = arith.constant 0 : index
    %c53_172 = arith.constant 53 : index
    %458 = vector.load %arg4[%c0_171, %c53_172] : memref<2x358xf32, #tpu.memory_space<vmem>>, vector<1x256xf32>
    %459 = vector.broadcast %456 : f32 to vector<1x256xf32>
    %460 = arith.mulf %459, %458 : vector<1x256xf32>
    %461 = arith.addf %455, %460 : vector<1x256xf32>
    %c1_173 = arith.constant 1 : index
    %c53_174 = arith.constant 53 : index
    %462 = vector.load %arg4[%c1_173, %c53_174] : memref<2x358xf32, #tpu.memory_space<vmem>>, vector<1x256xf32>
    %463 = vector.broadcast %457 : f32 to vector<1x256xf32>
    %464 = arith.mulf %463, %462 : vector<1x256xf32>
    %465 = arith.addf %461, %464 : vector<1x256xf32>
    %c33_175 = arith.constant 33 : index
    %466 = memref.load %arg1[%c33_175] : memref<98xf32, #tpu.memory_space<smem>>
    %c82_176 = arith.constant 82 : index
    %467 = memref.load %arg1[%c82_176] : memref<98xf32, #tpu.memory_space<smem>>
    %c0_177 = arith.constant 0 : index
    %c69 = arith.constant 69 : index
    %468 = vector.load %arg4[%c0_177, %c69] : memref<2x358xf32, #tpu.memory_space<vmem>>, vector<1x256xf32>
    %469 = vector.broadcast %466 : f32 to vector<1x256xf32>
    %470 = arith.mulf %469, %468 : vector<1x256xf32>
    %471 = arith.addf %465, %470 : vector<1x256xf32>
    %c1_178 = arith.constant 1 : index
    %c69_179 = arith.constant 69 : index
    %472 = vector.load %arg4[%c1_178, %c69_179] : memref<2x358xf32, #tpu.memory_space<vmem>>, vector<1x256xf32>
    %473 = vector.broadcast %467 : f32 to vector<1x256xf32>
    %474 = arith.mulf %473, %472 : vector<1x256xf32>
    %475 = arith.addf %471, %474 : vector<1x256xf32>
    %c40 = arith.constant 40 : index
    %476 = memref.load %arg1[%c40] : memref<98xf32, #tpu.memory_space<smem>>
    %c89 = arith.constant 89 : index
    %477 = memref.load %arg1[%c89] : memref<98xf32, #tpu.memory_space<smem>>
    %c0_180 = arith.constant 0 : index
    %c85_181 = arith.constant 85 : index
    %478 = vector.load %arg4[%c0_180, %c85_181] : memref<2x358xf32, #tpu.memory_space<vmem>>, vector<1x256xf32>
    %479 = vector.broadcast %476 : f32 to vector<1x256xf32>
    %480 = arith.mulf %479, %478 : vector<1x256xf32>
    %481 = arith.addf %475, %480 : vector<1x256xf32>
    %c1_182 = arith.constant 1 : index
    %c85_183 = arith.constant 85 : index
    %482 = vector.load %arg4[%c1_182, %c85_183] : memref<2x358xf32, #tpu.memory_space<vmem>>, vector<1x256xf32>
    %483 = vector.broadcast %477 : f32 to vector<1x256xf32>
    %484 = arith.mulf %483, %482 : vector<1x256xf32>
    %485 = arith.addf %481, %484 : vector<1x256xf32>
    %c47 = arith.constant 47 : index
    %486 = memref.load %arg1[%c47] : memref<98xf32, #tpu.memory_space<smem>>
    %c96_184 = arith.constant 96 : index
    %487 = memref.load %arg1[%c96_184] : memref<98xf32, #tpu.memory_space<smem>>
    %c0_185 = arith.constant 0 : index
    %c101 = arith.constant 101 : index
    %488 = vector.load %arg4[%c0_185, %c101] : memref<2x358xf32, #tpu.memory_space<vmem>>, vector<1x256xf32>
    %489 = vector.broadcast %486 : f32 to vector<1x256xf32>
    %490 = arith.mulf %489, %488 : vector<1x256xf32>
    %491 = arith.addf %485, %490 : vector<1x256xf32>
    %c1_186 = arith.constant 1 : index
    %c101_187 = arith.constant 101 : index
    %492 = vector.load %arg4[%c1_186, %c101_187] : memref<2x358xf32, #tpu.memory_space<vmem>>, vector<1x256xf32>
    %493 = vector.broadcast %487 : f32 to vector<1x256xf32>
    %494 = arith.mulf %493, %492 : vector<1x256xf32>
    %495 = arith.addf %491, %494 : vector<1x256xf32>
    %c-2_i32 = arith.constant -2 : i32
    %496 = vector.broadcast %c-2_i32 : i32 to vector<1x256xi32>
    %497 = arith.cmpi sge, %28, %496 : vector<1x256xi32>
    %c14_i32 = arith.constant 14 : i32
    %498 = vector.broadcast %c14_i32 : i32 to vector<1x256xi32>
    %499 = arith.cmpi slt, %28, %498 : vector<1x256xi32>
    %500 = arith.andi %497, %499 : vector<1x256xi1>
    %cst_188 = arith.constant 0.000000e+00 : f32
    %501 = vector.broadcast %cst_188 : f32 to vector<1x256xf32>
    %502 = arith.select %500, %495, %501 : vector<1x256xi1>, vector<1x256xf32>
    %503 = arith.addf %424, %502 : vector<1x256xf32>
    %cst_189 = arith.constant 0.000000e+00 : f32
    %504 = vector.broadcast %cst_189 : f32 to vector<1x256xf32>
    %c6 = arith.constant 6 : index
    %505 = memref.load %arg1[%c6] : memref<98xf32, #tpu.memory_space<smem>>
    %c55 = arith.constant 55 : index
    %506 = memref.load %arg1[%c55] : memref<98xf32, #tpu.memory_space<smem>>
    %c0_190 = arith.constant 0 : index
    %c6_191 = arith.constant 6 : index
    %507 = vector.load %arg4[%c0_190, %c6_191] : memref<2x358xf32, #tpu.memory_space<vmem>>, vector<1x256xf32>
    %508 = vector.broadcast %505 : f32 to vector<1x256xf32>
    %509 = arith.mulf %508, %507 : vector<1x256xf32>
    %510 = arith.addf %504, %509 : vector<1x256xf32>
    %c1_192 = arith.constant 1 : index
    %c6_193 = arith.constant 6 : index
    %511 = vector.load %arg4[%c1_192, %c6_193] : memref<2x358xf32, #tpu.memory_space<vmem>>, vector<1x256xf32>
    %512 = vector.broadcast %506 : f32 to vector<1x256xf32>
    %513 = arith.mulf %512, %511 : vector<1x256xf32>
    %514 = arith.addf %510, %513 : vector<1x256xf32>
    %c13 = arith.constant 13 : index
    %515 = memref.load %arg1[%c13] : memref<98xf32, #tpu.memory_space<smem>>
    %c62 = arith.constant 62 : index
    %516 = memref.load %arg1[%c62] : memref<98xf32, #tpu.memory_space<smem>>
    %c0_194 = arith.constant 0 : index
    %c22_195 = arith.constant 22 : index
    %517 = vector.load %arg4[%c0_194, %c22_195] : memref<2x358xf32, #tpu.memory_space<vmem>>, vector<1x256xf32>
    %518 = vector.broadcast %515 : f32 to vector<1x256xf32>
    %519 = arith.mulf %518, %517 : vector<1x256xf32>
    %520 = arith.addf %514, %519 : vector<1x256xf32>
    %c1_196 = arith.constant 1 : index
    %c22_197 = arith.constant 22 : index
    %521 = vector.load %arg4[%c1_196, %c22_197] : memref<2x358xf32, #tpu.memory_space<vmem>>, vector<1x256xf32>
    %522 = vector.broadcast %516 : f32 to vector<1x256xf32>
    %523 = arith.mulf %522, %521 : vector<1x256xf32>
    %524 = arith.addf %520, %523 : vector<1x256xf32>
    %c20_198 = arith.constant 20 : index
    %525 = memref.load %arg1[%c20_198] : memref<98xf32, #tpu.memory_space<smem>>
    %c69_199 = arith.constant 69 : index
    %526 = memref.load %arg1[%c69_199] : memref<98xf32, #tpu.memory_space<smem>>
    %c0_200 = arith.constant 0 : index
    %c38_201 = arith.constant 38 : index
    %527 = vector.load %arg4[%c0_200, %c38_201] : memref<2x358xf32, #tpu.memory_space<vmem>>, vector<1x256xf32>
    %528 = vector.broadcast %525 : f32 to vector<1x256xf32>
    %529 = arith.mulf %528, %527 : vector<1x256xf32>
    %530 = arith.addf %524, %529 : vector<1x256xf32>
    %c1_202 = arith.constant 1 : index
    %c38_203 = arith.constant 38 : index
    %531 = vector.load %arg4[%c1_202, %c38_203] : memref<2x358xf32, #tpu.memory_space<vmem>>, vector<1x256xf32>
    %532 = vector.broadcast %526 : f32 to vector<1x256xf32>
    %533 = arith.mulf %532, %531 : vector<1x256xf32>
    %534 = arith.addf %530, %533 : vector<1x256xf32>
    %c27 = arith.constant 27 : index
    %535 = memref.load %arg1[%c27] : memref<98xf32, #tpu.memory_space<smem>>
    %c76 = arith.constant 76 : index
    %536 = memref.load %arg1[%c76] : memref<98xf32, #tpu.memory_space<smem>>
    %c0_204 = arith.constant 0 : index
    %c54_205 = arith.constant 54 : index
    %537 = vector.load %arg4[%c0_204, %c54_205] : memref<2x358xf32, #tpu.memory_space<vmem>>, vector<1x256xf32>
    %538 = vector.broadcast %535 : f32 to vector<1x256xf32>
    %539 = arith.mulf %538, %537 : vector<1x256xf32>
    %540 = arith.addf %534, %539 : vector<1x256xf32>
    %c1_206 = arith.constant 1 : index
    %c54_207 = arith.constant 54 : index
    %541 = vector.load %arg4[%c1_206, %c54_207] : memref<2x358xf32, #tpu.memory_space<vmem>>, vector<1x256xf32>
    %542 = vector.broadcast %536 : f32 to vector<1x256xf32>
    %543 = arith.mulf %542, %541 : vector<1x256xf32>
    %544 = arith.addf %540, %543 : vector<1x256xf32>
    %c34_208 = arith.constant 34 : index
    %545 = memref.load %arg1[%c34_208] : memref<98xf32, #tpu.memory_space<smem>>
    %c83_209 = arith.constant 83 : index
    %546 = memref.load %arg1[%c83_209] : memref<98xf32, #tpu.memory_space<smem>>
    %c0_210 = arith.constant 0 : index
    %c70_211 = arith.constant 70 : index
    %547 = vector.load %arg4[%c0_210, %c70_211] : memref<2x358xf32, #tpu.memory_space<vmem>>, vector<1x256xf32>
    %548 = vector.broadcast %545 : f32 to vector<1x256xf32>
    %549 = arith.mulf %548, %547 : vector<1x256xf32>
    %550 = arith.addf %544, %549 : vector<1x256xf32>
    %c1_212 = arith.constant 1 : index
    %c70_213 = arith.constant 70 : index
    %551 = vector.load %arg4[%c1_212, %c70_213] : memref<2x358xf32, #tpu.memory_space<vmem>>, vector<1x256xf32>
    %552 = vector.broadcast %546 : f32 to vector<1x256xf32>
    %553 = arith.mulf %552, %551 : vector<1x256xf32>
    %554 = arith.addf %550, %553 : vector<1x256xf32>
    %c41 = arith.constant 41 : index
    %555 = memref.load %arg1[%c41] : memref<98xf32, #tpu.memory_space<smem>>
    %c90 = arith.constant 90 : index
    %556 = memref.load %arg1[%c90] : memref<98xf32, #tpu.memory_space<smem>>
    %c0_214 = arith.constant 0 : index
    %c86_215 = arith.constant 86 : index
    %557 = vector.load %arg4[%c0_214, %c86_215] : memref<2x358xf32, #tpu.memory_space<vmem>>, vector<1x256xf32>
    %558 = vector.broadcast %555 : f32 to vector<1x256xf32>
    %559 = arith.mulf %558, %557 : vector<1x256xf32>
    %560 = arith.addf %554, %559 : vector<1x256xf32>
    %c1_216 = arith.constant 1 : index
    %c86_217 = arith.constant 86 : index
    %561 = vector.load %arg4[%c1_216, %c86_217] : memref<2x358xf32, #tpu.memory_space<vmem>>, vector<1x256xf32>
    %562 = vector.broadcast %556 : f32 to vector<1x256xf32>
    %563 = arith.mulf %562, %561 : vector<1x256xf32>
    %564 = arith.addf %560, %563 : vector<1x256xf32>
    %c48_218 = arith.constant 48 : index
    %565 = memref.load %arg1[%c48_218] : memref<98xf32, #tpu.memory_space<smem>>
    %c97_219 = arith.constant 97 : index
    %566 = memref.load %arg1[%c97_219] : memref<98xf32, #tpu.memory_space<smem>>
    %c0_220 = arith.constant 0 : index
    %c102 = arith.constant 102 : index
    %567 = vector.load %arg4[%c0_220, %c102] : memref<2x358xf32, #tpu.memory_space<vmem>>, vector<1x256xf32>
    %568 = vector.broadcast %565 : f32 to vector<1x256xf32>
    %569 = arith.mulf %568, %567 : vector<1x256xf32>
    %570 = arith.addf %564, %569 : vector<1x256xf32>
    %c1_221 = arith.constant 1 : index
    %c102_222 = arith.constant 102 : index
    %571 = vector.load %arg4[%c1_221, %c102_222] : memref<2x358xf32, #tpu.memory_space<vmem>>, vector<1x256xf32>
    %572 = vector.broadcast %566 : f32 to vector<1x256xf32>
    %573 = arith.mulf %572, %571 : vector<1x256xf32>
    %574 = arith.addf %570, %573 : vector<1x256xf32>
    %c-3_i32 = arith.constant -3 : i32
    %575 = vector.broadcast %c-3_i32 : i32 to vector<1x256xi32>
    %576 = arith.cmpi sge, %28, %575 : vector<1x256xi32>
    %c13_i32 = arith.constant 13 : i32
    %577 = vector.broadcast %c13_i32 : i32 to vector<1x256xi32>
    %578 = arith.cmpi slt, %28, %577 : vector<1x256xi32>
    %579 = arith.andi %576, %578 : vector<1x256xi1>
    %cst_223 = arith.constant 0.000000e+00 : f32
    %580 = vector.broadcast %cst_223 : f32 to vector<1x256xf32>
    %581 = arith.select %579, %574, %580 : vector<1x256xi1>, vector<1x256xf32>
    %582 = arith.addf %503, %581 : vector<1x256xf32>
    %583 = arith.negf %582 : vector<1x256xf32>
    %584 = math.exp %583 : vector<1x256xf32>
    %cst_224 = arith.constant 1.000000e+00 : f32
    %585 = vector.broadcast %cst_224 : f32 to vector<1x256xf32>
    %586 = arith.addf %585, %584 : vector<1x256xf32>
    %587 = arith.divf %585, %586 : vector<1x256xf32>
    %588 = vector.broadcast %587 : vector<1x256xf32> to vector<4x256xf32>
    %589 = arith.mulf %1, %588 : vector<4x256xf32>
    %c0_225 = arith.constant 0 : index
    %c0_226 = arith.constant 0 : index
    %c0_227 = arith.constant 0 : index
    %590 = vector.load %arg3[%c0_225, %c0_226, %c0_227] : memref<1x4x256xf32, #tpu.memory_space<vmem>>, vector<1x4x256xf32>
    %591 = vector.shape_cast %590 : vector<1x4x256xf32> to vector<4x256xf32>
    %592 = vector.shape_cast %589 : vector<4x256xf32> to vector<1x4x256xf32>
    tpu.vector_store %arg3[%c0_225, %c0_226, %c0_227], %592 {strides = array<i32>} : memref<1x4x256xf32, #tpu.memory_space<vmem>>, vector<1x4x256xf32>,
    return
  }
  func.func @transform_0(%arg0: i32) -> i32 {
    %c0_i32 = arith.constant 0 : i32
    %c0_i32_0 = arith.constant 0 : i32
    return %c0_i32 : i32
  }
  func.func @transform_1(%arg0: i32) -> (i32, i32, i32) {
    %c0_i32 = arith.constant 0 : i32
    %c0_i32_0 = arith.constant 0 : i32
    %c0_i32_1 = arith.constant 0 : i32
    return %arg0, %c0_i32, %c0_i32_0 : i32, i32, i32
  }
  func.func @transform_2(%arg0: i32) -> (i32, i32, i32) {
    %c0_i32 = arith.constant 0 : i32
    %c0_i32_0 = arith.constant 0 : i32
    %c0_i32_1 = arith.constant 0 : i32
    return %arg0, %c0_i32, %c0_i32_0 : i32, i32, i32
  }
}

</mosaic_0001>

<bundles_post_ra>
// kernel: tpu_custom_call.1
= control target key start
LH: loop header
LB: loop body
LE: loop exit
PB: predicated region body
PF: predicated region fallthrough
CT: control target
= control target key end

     0   :  { %s2636_s0 = inlined_call_operand.hbm [shape: f32[98], index: 0, kind: input, shape index: {}]   ;;  %s2637_s1 = inlined_call_operand.hbm [shape: f32[2,4,256], index: 1, kind: input, shape index: {}]   ;;  %s2638_s2 = inlined_call_operand.hbm [shape: f32[2,4,256], index: 2, kind: output, shape index: {}]  }
   0x1   :  { %2652 = sst [smem:[#allocation16_spill]] %s2636_s0 }
   0x2   :  { %2653 = sst [smem:[#allocation17_spill]] %s2637_s1 }
   0x3   :  { %7 = vsyncpa [#allocation6], 0 }
   0x4   :  { %8 = vsyncpa [#allocation4], 0 }
   0x5   :  { %10 = vsyncpa [#allocation4 + $0x1], 0 }
   0x6   :  { %11 = vsyncpa [#allocation5], 0 }
   0x7   :  { %13 = vsyncpa [#allocation5 + $0x1], 0  ;;  %s1888_s9 = smov 0   ;;  %s1890_s10 = smov 0  }
   0x8   :  { %s1892_s11 = smov 0   ;;  %s1894_s12 = smov 0  }
   0x9 LB: > { %2654 = sst [smem:[#allocation12_spill]] %s1845_s10  ;;  %s1909_s13 = sadd.s32 4294967295, %s1853_s12   ;;  %s1853_s12 = sphi %s1894_s12, %s2684_s12   ;;  %s1849_s11 = sphi %s1892_s11, %s2683_s11   ;;  %s1845_s10 = sphi %s1890_s10, %s2682_s10   ;;  %s1841_s9 = sphi %s1888_s9, %s2681_s9  }
   0xa   : > { %2655 = sst [smem:[#allocation13_spill]] %s1849_s11  ;;  %s1547_s14 = sadd.s32 4294967294, %s1853_s12  }
   0xb   : > { %p60_p0 = scmp.ne.s32.totalorder %s1845_s10, %s1841_s9  ;;  %p2639_p1 = scmp.eq.s32.totalorder %s1909_s13, 0 }
   0xc   : > { %p84_p2 = scmp.eq.s32.totalorder %s1909_s13, 1  ;;  %p90_p3 = scmp.eq.s32.totalorder %s1547_s14, 1 }
   0xd   : > { %p1918_p4 = por %p2639_p1, %p60_p0  ;;  %p1548_p5 = scmp.ge.s32.totalorder %s1853_s12, 1 }
   0xe   : > { %p1923_p6 = por %p90_p3, %p60_p0  ;;  %p97_p7 = scmp.lt.s32.totalorder %s1853_s12, 3 }
   0xf   : > { %s2656_s15 = scalar_select %p1918_p4, 1, 0 }
  0x10   : > { %s2657_s16 = scalar_select %p1923_p6, 1, 0 }
  0x11   : > { %p1928_p8 = pnand %p1548_p5, %p97_p7  ;;  %s1934_s18 = sadd.s32 1, %s1853_s12  }
  0x12   : > { %s44_s19 = ssub.s32 %s1853_s12, %s1934_s18  ;;  %s47_s20 = sadd.s32 1, %s1849_s11 }
  0x13   : > { %s2658_s17 = scalar_select %p1928_p8, 1, 0 }
  0x14   : > { %p1672_p10 = pneg %p1928_p8  ;;  %p45_p12 = scmp.eq.s32.totalorder %s44_s19, 0 }
  0x15   : > { %p54_p13 = scmp.ne.s32.totalorder %s1849_s11, %s1845_s10  ;;  %p55_p0 = scmp.eq.s32.totalorder %s1853_s12, 0 }
  0x16   : > { %p1673_p11 = pnand %p1672_p10, %p2639_p1  ;;  %p1685_p3 = scmp.lt.s32.totalorder %s1853_s12, 2 }
  0x17   : > { %s1855_s21 = smov [#allocation3]   ;;  %s2659_s0 = sld [smem:[#allocation16_spill]] }
  0x18   : > { %s1951_s24 = scalar_select %p45_p12, %s1849_s11, %s47_s20  }
  0x19   : > { %p56_p5 = por %p55_p0, %p54_p13  ;;  %p1955_p7 = por %p84_p2, %p54_p13 }
  0x1a   : > { %2660 = sst [smem:[#allocation14_spill]] %s1951_s24  ;;  %s119_s26 = sand.u32 1, %s1849_s11  }
  0x1b   : > { %s2661_s25 = scalar_select %p1955_p7, 1, 0 }
  0x1c   : > { %s1662_s27 = sshll.u32 %s1853_s12, 7  ;;  %s1551_s28 = sshll.u32 %s119_s26, 3 }
  0x1d   : > { %1675 = dma.hbm_to_smem (!%p1673_p11), %s2659_s0, 16, %s1855_s21, [#allocation6]  }
  0x1e   : > { %s2662_s1 = sld [smem:[#allocation17_spill]]  ;;  %s123_s4 = scalar_lea.vmem [#allocation7], %s1551_s28 }
  0x1f   : > { %s131_s5 = sshll.u32 %s123_s4, 4  ;;  %p1966_p10 = pnand %p1685_p3, %p56_p5  ;;  %s132_s5 = int_to_ptr.vmem [resolvable:$true] %s131_s5 }
  0x20   : > { %s120_s7 = scalar_lea.sflag [#allocation4], %s119_s26 }
  0x21   : > { %p1759_p11 = pneg %p1966_p10 }
  0x24   : > { %s1964_s3 = scalar_lea.hbm %s2662_s1, %s1662_s27  ;;  %s1762_s20 = scalar_lea.hbm %s2662_s1, 256 }
  0x25   : > { %s1757_s8 = scalar_lea.hbm %s1964_s3, 128  ;;  %p1763_p0 = scmp.lt.s32.totalorder %s1964_s3, %s2662_s1 }
  0x26   : > { %p1758_p2 = scmp.ne.s32.totalorder %s1964_s3, %s1757_s8  ;;  %p1764_p3 = scmp.lt.s32.totalorder %s1762_s20, %s1757_s8 }
  0x28   : > { %p1760_p12 = pnand %p1759_p11, %p1758_p2  ;;  %p1765_p5 = por %p1764_p3, %p1763_p0 }
  0x2a   : > { %p1761_p13 = pneg %p1760_p12 }
  0x2c   : > { %p1766_p9 = pnand %p1765_p5, %p1761_p13 }
  0x2e   : > { %1769 = shalt.err (!%p1766_p9)
}
  0x2f   : > { %s1770_s23 = scalar_lea.vmem %s132_s5, 128  ;;  %s1856_s26 = smov [#allocation7]  }
  0x30   : > { %p1771_p1 = scmp.ne.s32.totalorder %s132_s5, %s1770_s23  ;;  %s1775_s27 = sshll.u32 %s1856_s26, 4  ;;  %s1776_s27 = int_to_ptr.vmem [resolvable:$false] %s1775_s27 }
  0x31   : > { %s1777_s28 = scalar_lea.vmem %s1776_s27, 256  ;;  %p1778_p2 = scmp.lt.s32.totalorder %s132_s5, %s1776_s27 }
  0x32   : > { %p1773_p6 = pnand %p1771_p1, %p1759_p11  ;;  %p1779_p12 = scmp.lt.s32.totalorder %s1777_s28, %s1770_s23 }
  0x34   : > { %p1774_p7 = pneg %p1773_p6  ;;  %p1780_p4 = por %p1779_p12, %p1778_p2 }
  0x36   : > { %p1781_p8 = pnand %p1780_p4, %p1774_p7 }
  0x38   : > { %1784 = shalt.err (!%p1781_p8)
}
  0x39   : > { %1679 = dma.hbm_to_vmem [thread:$0]  (!%p1966_p10), %s1964_s3, 128, %s132_s5, %s120_s7  }
  0x3a   : > { %p2664_p13 = scmp.ne.s32.totalorder %s2658_s17, 0 }
  0x3c   : > { %140 = sbr.rel (%p2664_p13) target bundleno = 682 (0x2aa), region = 28 }
  0x41   : > { %p2665_p9 = scmp.eq.s32.totalorder %s1909_s13, 0 }
  0x43   : > { %1828 = dma.done.wait (%p2665_p9), [#allocation6], 16   ;;  %p2666_p1 = pmov %p2665_p9 }
  0x44   : > { %s1991_s29 = sand.u32 1, %s1845_s10   ;;  %p2667_p4 = scmp.ne.s32.totalorder %s2656_s15, 0 }
  0x45   : > { %1830 = vsyncadd (%p2666_p1), [#allocation6], 4294967280  ;;  %s2643_s30 = sshll.u32 %s1991_s29, 3  ;;  %s147_s4 = scalar_lea.sflag [#allocation4], %s1991_s29 }
  0x46   : > { %s1997_s3 = scalar_lea.vmem [#allocation7], %s2643_s30 }
  0x47   : > { %1832 = dma.done.wait (%p2667_p4), %s147_s4, 128  }
  0x48   : > { %1834 = vsyncadd (%p2667_p4), %s147_s4, 4294967168 }
  0x49   : > { %155 = sfence }
  0x4a   : > { %v172_v0 = vld [vmem:[%s1997_s3] sm:$0xff]  ;;  %vm176_vm0 = vcmask 1043456   ;;  %vm208_vm1 = vcmask 1041408   ;;  %vm209_vm2 = vcmask 1043458   ;;  %vm211_vm4 = vcmask 832516   ;;  %s1859_s15 = smov 51  }
  0x4b   : > { %v174_v1 = vcombine.high %v172_v0, %v172_v0  ;;  %v194_v2 = vsel %vm176_vm0, %v172_v0, -inf  ;;  %v177_v3 = vsel %vm176_vm0, %v172_v0, 0.0  ;;  %vm210_vm3 = vmor %vm209_vm2, %vm208_vm1  ;;  %v1857_v14 = vmov 1966171168   ;;  %s1560_s17 = sld [smem:[#allocation3 + $0x38]]  ;;  %s1862_s11 = smov 80  }
  0x4c   : > { %v195_v4 = vrot.slane %v194_v2, 4  ;;  %v178_v5 = vrot.slane %v177_v3, 4  ;;  %vm212_vm5 = vmor %vm211_vm4, %vm210_vm3  ;;  %v218_v15 = vunpack.c.l.s4 %v1857_v14  ;;  %v2650_v16 = vlaneseq  ;;  %s1574_s5 = sld [smem:[#allocation3 + $0x39]]  ;;  %p2678_p8 = scmp.ne.s32.totalorder %s2661_s25, 0 }
  0x4d   : > { %v201_v6 = vsel %vm176_vm0, %v174_v1, -inf  ;;  %v184_v7 = vsel %vm176_vm0, %v174_v1, 0.0  ;;  %v1858_v17 = vmov 0.0   ;;  %vm234_vm8 = vcmask 416768   ;;  %s2022_s6 = sld [smem:[#allocation3 + $0x3a]] }
  0x4e   : > { %v196_v8 = vmax.f32 %v194_v2, %v195_v4  ;;  %v202_v9 = vrot.slane %v201_v6, 4  ;;  %v179_v10 = vadd.f32 %v178_v5, %v177_v3  ;;  %v185_v11 = vrot.slane %v184_v7, 4  ;;  %213 = vst.msk [vmem:[#allocation2] sm:$0x3f] %vm212_vm5, %v1858_v17  ;;  %s2024_s7 = sld [smem:[#allocation3 + $0x3b]] }
  0x4f   : > { %v219_v26 = vunpack.c.0.s8 %v218_v15  ;;  %v2005_v27 = vshrl.u32 %v2650_v16, 7  ;;  %vm2009_vm6 = vcmp.ge.s32.totalorder %v2650_v16, 51  ;;  %vm2014_vm7 = vcmp.lt.s32.totalorder %v2650_v16, 307  ;;  %s2026_s8 = sld [smem:[#allocation3 + $0x40]] }
  0x50   : > { %v197_v12 = vrot.slane %v196_v8, 2  ;;  %v203_v13 = vmax.f32 %v201_v6, %v202_v9  ;;  %v180_v18 = vrot.slane %v179_v10, 2  ;;  %v186_v19 = vadd.f32 %v185_v11, %v184_v7  ;;  %vm240_vm9 = vmand %vm2009_vm6, %vm2014_vm7  ;;  %s2028_s14 = sld [smem:[#allocation3 + $0x41]] }
  0x51   : > { %v222_v35 = vsub.s32 %v219_v26, %v2005_v27  ;;  %s2030_s19 = sld [smem:[#allocation3 + $0x3c]]  ;;  %v317_v53 = vstv %s1560_s17  ;;  %vm312_vm10 = vcmask 916480   ;;  %vm334_vm11 = vcmask 785408  }
  0x52   : > { %v198_v20 = vmax.f32 %v196_v8, %v197_v12  ;;  %v204_v21 = vrot.slane %v203_v13, 2  ;;  %v181_v22 = vadd.f32 %v180_v18, %v179_v10  ;;  %v187_v23 = vrot.slane %v186_v19, 2  ;;  %s2032_s20 = sld [smem:[#allocation3 + $0x47]] }
  0x53   : > { %s2034_s21 = sld [smem:[#allocation3 + $0x3d]]  ;;  %v471_v54 = vstv %s1574_s5  ;;  %v633_v58 = vstv %s2022_s6  ;;  %vm355_vm12 = vcmask 654336   ;;  %vm376_vm13 = vcmask 523264  }
  0x54   : > { %v199_v24 = vrot.slane %v198_v20, 1  ;;  %v205_v25 = vmax.f32 %v203_v13, %v204_v21  ;;  %v182_v28 = vrot.slane %v181_v22, 1  ;;  %v188_v29 = vadd.f32 %v187_v23, %v186_v19  ;;  %s2036_s22 = sld [smem:[#allocation3 + $0x43]] }
  0x55   : > { %s2038_s23 = sld [smem:[#allocation3 + $0x42]]  ;;  %v795_v59 = vstv %s2024_s7  ;;  %v491_v62 = vstv %s2026_s8  ;;  %vm397_vm14 = vcmask 392192   ;;  %vm418_vm15 = vcmask 261120  }
  0x56   : > { %v200_v30 = vmax.f32 %v198_v20, %v199_v24  ;;  %v206_v31 = vrot.slane %v205_v25, 1  ;;  %v183_v32 = vadd.f32 %v182_v28, %v181_v22  ;;  %v189_v33 = vrot.slane %v188_v29, 1  ;;  %s2040_s26 = sld [smem:[#allocation3 + $0x3e]] }
  0x57   : > { %s2044_s27 = sld [smem:[#allocation3 + $0x48]]  ;;  %v653_v63 = vstv %s2028_s14  ;;  %v957_v2 = vstv %s2030_s19  ;;  %s2646_s14 = smov 96   ;;  %vm605_vm0 = vcmask 1039360   ;;  %vm767_vm1 = vcmask 1031168  }
  0x58   : > { %v207_v34 = vmax.f32 %v205_v25, %v206_v31  ;;  %v190_v36 = vadd.f32 %v189_v33, %v188_v29  ;;  %v192_v37 = vmul.f32 0.25, %v183_v32  ;;  %s2048_s28 = sld [smem:[#allocation3 + $0x4e]]  ;;  %v511_v3 = vstv %s2032_s20 }
  0x59   : > { %s2052_s4 = sld [smem:[#allocation3 + $0x44]]  ;;  %v1119_v6 = vstv %s2034_s21  ;;  %s2673_s21 = smov 96   ;;  %vm1091_vm6 = vcmask 1014784  }
  0x5a   : > { %v244_v38 = vcombine.low %v200_v30, %v207_v34  ;;  %v193_v39 = vmul.f32 0.25, %v190_v36  ;;  %s2056_s17 = sld [smem:[#allocation3 + $0x4a]]  ;;  %v977_v7 = vstv %s2036_s22 }
  0x5b   : > { %s2058_s5 = sld [smem:[#allocation3 + $0x3]]  ;;  %v815_v10 = vstv %s2038_s23 }
  0x5c   : > { %v251_v40 = vrot.slane %v244_v38, %v222_v35  ;;  %v216_v41 = vcombine.low %v192_v37, %v193_v39  ;;  %s2062_s30 = sld [smem:[#allocation3 + $0x34]]  ;;  %v1281_v11 = vstv %s2040_s26 }
  0x5d   : > { %s2066_s6 = sld [smem:[#allocation3 + $0x1]]  ;;  %v673_v12 = vstv %s2044_s27 }
  0x5e   : > { %v258_v42 = vrot.slane %v251_v40, %v222_v35  ;;  %v223_v43 = vrot.slane %v216_v41, %v222_v35  ;;  %s2070_s7 = sld [smem:[#allocation3 + $0x32]]  ;;  %v531_v13 = vstv %s2048_s28 }
  0x5f   : > { %s2072_s0 = sld [smem:[#allocation3 + $0x2]]  ;;  %v1139_v14 = vstv %s2052_s4 }
  0x60   : > { %259 = vrot.lane.b32.xlu0 %v258_v42, %s1859_s15  ;;  %v230_v44 = vrot.slane %v223_v43, %v222_v35  ;;  %s2076_s1 = sld [smem:[#allocation3 + $0x33]]  ;;  %v997_v15 = vstv %s2056_s17 }
  0x61   : > { %s2080_s8 = sld [smem:[#allocation3 + $0x5]]  ;;  %v778_v17 = vstv %s2058_s5 }
  0x62   : > { %s2086_s24 = sld [smem:[#allocation3 + $0x4]]  ;;  %v781_v18 = vstv %s2062_s30 }
  0x63   : > { %s2090_s19 = sld [smem:[#allocation3 + $0x35]]  ;;  %v454_v19 = vstv %s2066_s6 }
  0x64   : > { %231 = vrot.lane.b32.xlu0 %v230_v44, %s1859_s15  ;;  %s2644_s15 = smov 112   ;;  %s2094_s20 = sld [smem:[#allocation3 + $0x6]]  ;;  %v457_v20 = vstv %s2070_s7 }
  0x65   : > { %s2098_s10 = sld [smem:[#allocation3 + $0x37]]  ;;  %v616_v24 = vstv %s2072_s0 }
  0x66   : > { %s2118_s22 = sld [smem:[#allocation3 + $0x49]]  ;;  %v619_v25 = vstv %s2076_s1 }
  0x67   : > { %s2122_s23 = sld [smem:[#allocation3 + $0x45]]  ;;  %v1102_v26 = vstv %s2080_s8 }
  0x68   : > { %v940_v29 = vstv %s2086_s24  ;;  %s2138_s0 = sld [smem:[#allocation3 + $0x4f]] }
  0x69   : > { %v943_v30 = vstv %s2090_s19  ;;  %s2143_s1 = sld [smem:[#allocation3 + $0x55]] }
  0x6a   : > { %v1264_v32 = vstv %s2094_s20  ;;  %s1634_s24 = sld [smem:[#allocation3 + $0x4b]]  ;;  %s1865_s20 = smov 32  }
  0x6b   : > { %v1267_v33 = vstv %s2098_s10  ;;  %s1863_s10 = smov 64   ;;  %s1622_s30 = sld [smem:[#allocation3 + $0x51]] }
  0x6c   : > { %s1608_s26 = sld [smem:[#allocation3 + $0x50]] }
  0x6d   : > { %s1648_s27 = sld [smem:[#allocation3 + $0x4c]] }
  0x6e   : > { %s1596_s28 = sld [smem:[#allocation3 + $0x56]] }
  0x6f   : > { %s1584_s4 = sld [smem:[#allocation3 + $0x5c]] }
  0x70   : > { %s1636_s17 = sld [smem:[#allocation3 + $0x52]] }
  0x71   : > { %s1598_s5 = sld [smem:[#allocation3 + $0x5d]] }
  0x72   : > { %s1610_s6 = sld [smem:[#allocation3 + $0x57]] }
  0x73   : > { %s1638_s7 = sld [smem:[#allocation3 + $0x59]] }
  0x74   : > { %s1624_s8 = sld [smem:[#allocation3 + $0x58]] }
  0x75   : > { %s1612_s19 = sld [smem:[#allocation3 + $0x5e]] }
  0xd2   : > { %v260_v47 = vpop.permute.xlu0 %259 }
  0xd3   : > { %v261_v48 = vrot.slane %v260_v47, 7 }
  0xd5   : > { %v262_v49 = vsel %vm234_vm8, %v261_v48, %v260_v47 }
  0xd6   : > { %265 = vst.msk [vmem:[#allocation2 + $0x1] ss:$2 sm:$0x7] %vm240_vm9, %v262_v49  ;;  %v232_v50 = vpop.permute.xlu0 %231 }
  0xd7   : > { %v233_v51 = vrot.slane %v232_v50, 7 }
  0xd9   : > { %v235_v52 = vsel %vm234_vm8, %v233_v51, %v232_v50 }
  0xda   : > { %241 = vst.msk [vmem:[#allocation2] ss:$2 sm:$0x7] %vm240_vm9, %v235_v52  ;;  %vm929_vm9 = vcmask 1022976  }
  0xdd   : > { %v2042_v55 = vld [vmem:[#allocation2 + $0x1] ss:$2 sm:$0x7] }
  0xde   : > { %v318_v56 = vmul.f32 %v317_v53, %v2042_v55  ;;  %v472_v57 = vmul.f32 %v471_v54, %v2042_v55  ;;  %v634_v60 = vmul.f32 %v633_v58, %v2042_v55  ;;  %v796_v61 = vmul.f32 %v795_v59, %v2042_v55 }
  0xdf   : > { %v492_v0 = vmul.f32 %v491_v62, %v2042_v55  ;;  %v654_v1 = vmul.f32 %v653_v63, %v2042_v55  ;;  %v958_v4 = vmul.f32 %v957_v2, %v2042_v55  ;;  %v512_v5 = vmul.f32 %v511_v3, %v2042_v55 }
  0xe0   : > { %320 = vrot.lane.b32.xlu1 %v318_v56, %s2644_s15  ;;  %474 = vrot.lane.b32.xlu0 %v472_v57, %s2644_s15  ;;  %v1120_v8 = vmul.f32 %v1119_v6, %v2042_v55  ;;  %v978_v9 = vmul.f32 %v977_v7, %v2042_v55  ;;  %v816_v22 = vmul.f32 %v815_v10, %v2042_v55  ;;  %v835_v54 = vstv %s2118_s22  ;;  %s1650_s22 = sld [smem:[#allocation3 + $0x53]] }
  0xe1   : > { %v2114_v21 = vld [vmem:[#allocation2] ss:$2 sm:$0x7]  ;;  %v1282_v23 = vmul.f32 %v1281_v11, %v2042_v55  ;;  %v674_v31 = vmul.f32 %v673_v12, %v2042_v55  ;;  %v782_v35 = vmul.f32 %v781_v18, %v2042_v55  ;;  %v458_v37 = vmul.f32 %v457_v20, %v2042_v55 }
  0xe2   : > { %v779_v34 = vmul.f32 %v778_v17, %v2114_v21  ;;  %v455_v36 = vmul.f32 %v454_v19, %v2114_v21  ;;  %v532_v38 = vmul.f32 %v531_v13, %v2042_v55  ;;  %v617_v39 = vmul.f32 %v616_v24, %v2114_v21 }
  0xe3   : > { %v620_v40 = vmul.f32 %v619_v25, %v2042_v55  ;;  %v1103_v41 = vmul.f32 %v1102_v26, %v2114_v21  ;;  %v941_v45 = vmul.f32 %v940_v29, %v2114_v21  ;;  %v944_v47 = vmul.f32 %v943_v30, %v2042_v55 }
  0xe4   : > { %636 = vrot.lane.b32.xlu1 %v634_v60, %s2644_s15  ;;  %798 = vrot.lane.b32.xlu0 %v796_v61, %s2644_s15  ;;  %s2084_s15 = sld [smem:[#allocation3 + $0x36]]  ;;  %v2145_v42 = vadd.f32 %v782_v35, %v779_v34  ;;  %v2147_v43 = vadd.f32 %v458_v37, %v455_v36  ;;  %v1265_v48 = vmul.f32 %v1264_v32, %v2114_v21  ;;  %v1301_v56 = vstv %s2122_s23 }
  0xe5   : > { %v2153_v46 = vadd.f32 %v620_v40, %v617_v39  ;;  %v1268_v50 = vmul.f32 %v1267_v33, %v2042_v55  ;;  %v1140_v51 = vmul.f32 %v1139_v14, %v2042_v55  ;;  %v998_v52 = vmul.f32 %v997_v15, %v2042_v55  ;;  %s1640_s23 = sld [smem:[#allocation3 + $0x60]] }
  0xe6   : > { %v2162_v53 = vadd.f32 %v944_v47, %v941_v45  ;;  %v836_v58 = vmul.f32 %v835_v54, %v2042_v55  ;;  %v1302_v59 = vmul.f32 %v1301_v56, %v2042_v55  ;;  %v693_v60 = vstv %s2138_s0  ;;  %s1561_s0 = sld [smem:[#allocation3 + $0xe]] }
  0xe7   : > { %v2166_v57 = vadd.f32 %v1268_v50, %v1265_v48  ;;  %v551_v61 = vstv %s2143_s1  ;;  %v694_v62 = vmul.f32 %v693_v60, %v2042_v55  ;;  %v1179_v12 = vstv %s1636_s17  ;;  %s1626_s1 = sld [smem:[#allocation3 + $0x5f]] }
  0xe8   : > { %494 = vrot.lane.b32.xlu1 %v492_v0, %s2646_s14  ;;  %656 = vrot.lane.b32.xlu0 %v654_v1, %s2646_s14  ;;  %s2672_s14 = smov 112   ;;  %v552_v63 = vmul.f32 %v551_v61, %v2042_v55  ;;  %v1159_v0 = vstv %s1634_s24  ;;  %v1017_v1 = vstv %s1622_s30  ;;  %v1180_v14 = vmul.f32 %v1179_v12, %v2042_v55  ;;  %s1575_s24 = sld [smem:[#allocation3 + $0xf]] }
  0xe9   : > { %v1160_v2 = vmul.f32 %v1159_v0, %v2042_v55  ;;  %v1018_v3 = vmul.f32 %v1017_v1, %v2042_v55  ;;  %v733_v13 = vstv %s1598_s5  ;;  %v875_v17 = vstv %s1610_s6  ;;  %s1652_s30 = sld [smem:[#allocation3 + $0x5a]] }
  0xea   : > { %v1105_v28 = vstv %s2084_s15  ;;  %s1864_s15 = smov 48   ;;  %v734_v15 = vmul.f32 %v733_v13, %v2042_v55  ;;  %v1199_v18 = vstv %s1638_s7  ;;  %v876_v19 = vmul.f32 %v875_v17, %v2042_v55  ;;  %s1629_s17 = sld [smem:[#allocation3 + $0xc]] }
  0xeb   : > { %v1106_v44 = vmul.f32 %v1105_v28, %v2042_v55  ;;  %v1200_v20 = vmul.f32 %v1199_v18, %v2042_v55  ;;  %v1341_v26 = vstv %s1650_s22  ;;  %v1219_v28 = vstv %s1640_s23  ;;  %s1587_s5 = sld [smem:[#allocation3 + $0x9]] }
  0xec   : > { %960 = vrot.lane.b32.xlu1 %v958_v4, %s2672_s14  ;;  %514 = vrot.lane.b32.xlu0 %v512_v5, %s1862_s11  ;;  %v855_v4 = vstv %s1608_s26  ;;  %v1321_v5 = vstv %s1648_s27  ;;  %v1342_v30 = vmul.f32 %v1341_v26, %v2042_v55  ;;  %s1601_s26 = sld [smem:[#allocation3 + $0xa]] }
  0xed   : > { %v2157_v49 = vadd.f32 %v1106_v44, %v1103_v41  ;;  %v856_v6 = vmul.f32 %v855_v4, %v2042_v55  ;;  %v1322_v7 = vmul.f32 %v1321_v5, %v2042_v55  ;;  %v328_v29 = vstv %s1561_s0  ;;  %s1559_s27 = sld [smem:[#allocation3 + $0x7]] }
  0xee   : > { %v1057_v32 = vstv %s1626_s1  ;;  %v329_v33 = vmul.f32 %v328_v29, %v2114_v21  ;;  %v482_v34 = vstv %s1575_s24  ;;  %s1617_s6 = sld [smem:[#allocation3 + $0x12]] }
  0xef   : > { %v1058_v35 = vmul.f32 %v1057_v32, %v2042_v55  ;;  %v1361_v36 = vstv %s1652_s30  ;;  %v483_v37 = vmul.f32 %v482_v34, %v2114_v21  ;;  %s1615_s7 = sld [smem:[#allocation3 + $0xb]] }
  0xf0   : > { %1122 = vrot.lane.b32.xlu1 %v1120_v8, %s2672_s14  ;;  %980 = vrot.lane.b32.xlu0 %v978_v9, %s2673_s21  ;;  %v713_v8 = vstv %s1596_s28  ;;  %v571_v9 = vstv %s1584_s4  ;;  %s1589_s28 = sld [smem:[#allocation3 + $0x10]] }
  0xf1   : > { %v714_v10 = vmul.f32 %v713_v8, %v2042_v55  ;;  %v572_v11 = vmul.f32 %v571_v9, %v2042_v55  ;;  %s1573_s4 = sld [smem:[#allocation3 + $0x8]] }
  0xf2   : > { %v786_v39 = vstv %s1601_s26  ;;  %s1579_s22 = sld [smem:[#allocation3 + $0x1d]] }
  0xf3   : > { %v306_v40 = vstv %s1559_s27  ;;  %v787_v41 = vmul.f32 %v786_v39, %v2114_v21  ;;  %s1603_s23 = sld [smem:[#allocation3 + $0x11]] }
  0xf4   : > { %818 = vrot.lane.b32.xlu1 %v816_v22, %s2673_s21  ;;  %1284 = vrot.lane.b32.xlu0 %v1282_v23, %s2672_s14  ;;  %v1037_v22 = vstv %s1624_s8  ;;  %v895_v23 = vstv %s1612_s19  ;;  %v307_v44 = vmul.f32 %v306_v40, %v2114_v21  ;;  %s1643_s8 = sld [smem:[#allocation3 + $0xd]] }
  0xf5   : > { %v1038_v24 = vmul.f32 %v1037_v22, %v2042_v55  ;;  %v896_v25 = vmul.f32 %v895_v23, %v2042_v55  ;;  %s1577_s19 = sld [smem:[#allocation3 + $0x16]] }
  0xf6   : > { %v644_v45 = vstv %s1589_s28  ;;  %s1619_s0 = sld [smem:[#allocation3 + $0x19]] }
  0xf7   : > { %v462_v47 = vstv %s1573_s4  ;;  %v645_v48 = vmul.f32 %v644_v45, %v2114_v21  ;;  %s1591_s1 = sld [smem:[#allocation3 + $0x17]] }
  0xf8   : > { %676 = vrot.lane.b32.xlu1 %v674_v31, %s1862_s11  ;;  %534 = vrot.lane.b32.xlu0 %v532_v38, %s1863_s10  ;;  %v1220_v31 = vmul.f32 %v1219_v28, %v2042_v55  ;;  %v1362_v38 = vmul.f32 %v1361_v36, %v2042_v55  ;;  %v463_v50 = vmul.f32 %v462_v47, %v2114_v21  ;;  %s1645_s24 = sld [smem:[#allocation3 + $0x14]] }
  0xf9   : > { %s1631_s30 = sld [smem:[#allocation3 + $0x13]] }
  0xfa   : > { %s1581_s26 = sld [smem:[#allocation3 + $0x24]] }
  0xfb   : > { %s1605_s27 = sld [smem:[#allocation3 + $0x18]] }
  0xfc   : > { %1142 = vrot.lane.b32.xlu1 %v1140_v51, %s2673_s21  ;;  %1000 = vrot.lane.b32.xlu0 %v998_v52, %s1862_s11  ;;  %v1110_v51 = vstv %s1629_s17  ;;  %v624_v52 = vstv %s1587_s5  ;;  %s1621_s28 = sld [smem:[#allocation3 + $0x20]] }
  0xfd   : > { %v1111_v54 = vmul.f32 %v1110_v51, %v2114_v21  ;;  %v625_v56 = vmul.f32 %v624_v52, %v2114_v21  ;;  %s1647_s4 = sld [smem:[#allocation3 + $0x1b]] }
  0xfe   : > { %s1633_s17 = sld [smem:[#allocation3 + $0x1a]] }
  0xff   : > { %s1583_s5 = sld [smem:[#allocation3 + $0x2b]] }
 0x100   : > { %838 = vrot.lane.b32.xlu1 %v836_v58, %s1862_s11  ;;  %1304 = vrot.lane.b32.xlu0 %v1302_v59, %s2673_s21  ;;  %v968_v58 = vstv %s1617_s6  ;;  %v948_v59 = vstv %s1615_s7  ;;  %s1607_s6 = sld [smem:[#allocation3 + $0x1f]] }
 0x101   : > { %v969_v60 = vmul.f32 %v968_v58, %v2114_v21  ;;  %v949_v61 = vmul.f32 %v948_v59, %v2114_v21  ;;  %s1623_s7 = sld [smem:[#allocation3 + $0x27]] }
 0x104   : > { %696 = vrot.lane.b32.xlu1 %v694_v62, %s1863_s10  ;;  %554 = vrot.lane.b32.xlu0 %v552_v63, %s1864_s15  ;;  %v1272_v62 = vstv %s1643_s8  ;;  %v502_v63 = vstv %s1577_s19  ;;  %s1595_s8 = sld [smem:[#allocation3 + $0x25]] }
 0x105   : > { %v1273_v0 = vmul.f32 %v1272_v62, %v2114_v21  ;;  %v503_v1 = vmul.f32 %v502_v63, %v2114_v21  ;;  %s1649_s19 = sld [smem:[#allocation3 + $0x22]] }
 0x106   : > { %v846_v32 = vstv %s1607_s6  ;;  %s1564_s6 = sld [smem:[#allocation3 + $0x46]] }
 0x107   : > { %v847_v36 = vmul.f32 %v846_v32, %v2114_v21 }
 0x108   : > { %1162 = vrot.lane.b32.xlu1 %v1160_v2, %s1862_s11  ;;  %1020 = vrot.lane.b32.xlu0 %v1018_v3, %s1863_s10  ;;  %v522_v2 = vstv %s1579_s22  ;;  %v806_v3 = vstv %s1603_s23  ;;  %s1635_s22 = sld [smem:[#allocation3 + $0x21]] }
 0x109   : > { %v523_v4 = vmul.f32 %v522_v2, %v2114_v21  ;;  %v807_v5 = vmul.f32 %v806_v3, %v2114_v21  ;;  %s1637_s23 = sld [smem:[#allocation3 + $0x28]] }
 0x10b   : > { %v1332_v45 = vstv %s1649_s19  ;;  %s1569_s19 = sld [smem:[#allocation3 + $0x2a]] }
 0x10c   : > { %858 = vrot.lane.b32.xlu1 %v856_v6, %s1863_s10  ;;  %1324 = vrot.lane.b32.xlu0 %v1322_v7, %s1862_s11  ;;  %v988_v6 = vstv %s1619_s0  ;;  %v664_v7 = vstv %s1591_s1  ;;  %s1609_s0 = sld [smem:[#allocation3 + $0x26]]  ;;  %v1333_v51 = vmul.f32 %v1332_v45, %v2114_v21 }
 0x10d   : > { %v989_v8 = vmul.f32 %v988_v6, %v2114_v21  ;;  %v665_v9 = vmul.f32 %v664_v7, %v2114_v21  ;;  %s1611_s1 = sld [smem:[#allocation3 + $0x2d]] }
 0x10e   : > { %v1170_v47 = vstv %s1635_s22  ;;  %s1568_s22 = sld [smem:[#allocation3 + $0x54]] }
 0x10f   : > { %v1171_v52 = vmul.f32 %v1170_v47, %v2114_v21 }
 0x110   : > { %716 = vrot.lane.b32.xlu1 %v714_v10, %s1864_s15  ;;  %574 = vrot.lane.b32.xlu0 %v572_v11, %s1865_s20  ;;  %v1292_v10 = vstv %s1645_s24  ;;  %v1130_v11 = vstv %s1631_s30  ;;  %s1597_s24 = sld [smem:[#allocation3 + $0x2c]] }
 0x111   : > { %v1293_v12 = vmul.f32 %v1292_v10, %v2114_v21  ;;  %v1131_v13 = vmul.f32 %v1130_v11, %v2114_v21  ;;  %s1639_s30 = sld [smem:[#allocation3 + $0x2f]]  ;;  %v412_v45 = vstv %s1569_s19 }
 0x113   : > { %v886_v62 = vstv %s1611_s1  ;;  %s1870_s1 = smov 123  }
 0x114   : > { %1182 = vrot.lane.b32.xlu1 %v1180_v14, %s1863_s10  ;;  %736 = vrot.lane.b32.xlu0 %v734_v15, %s1865_s20  ;;  %v542_v14 = vstv %s1581_s26  ;;  %v826_v15 = vstv %s1605_s27  ;;  %s1625_s26 = sld [smem:[#allocation3 + $0x2e]]  ;;  %v887_v2 = vmul.f32 %v886_v62, %v2114_v21 }
 0x115   : > { %v543_v17 = vmul.f32 %v542_v14, %v2114_v21  ;;  %v827_v18 = vmul.f32 %v826_v15, %v2114_v21  ;;  %s1654_s27 = sld [smem:[#allocation3 + $0x61]] }
 0x116   : > { %v724_v63 = vstv %s1597_s24  ;;  %s1871_s24 = smov 122  }
 0x117   : > { %v725_v3 = vmul.f32 %v724_v63, %v2114_v21 }
 0x118   : > { %878 = vrot.lane.b32.xlu1 %v876_v19, %s1864_s15  ;;  %1202 = vrot.lane.b32.xlu0 %v1200_v20, %s1864_s15  ;;  %v1008_v19 = vstv %s1621_s28  ;;  %s1651_s28 = sld [smem:[#allocation3 + $0x29]] }
 0x119   : > { %v1009_v22 = vmul.f32 %v1008_v19, %v2114_v21 }
 0x11b   : > { %v1381_v10 = vstv %s1654_s27 }
 0x11c   : > { %1040 = vrot.lane.b32.xlu1 %v1038_v24, %s1864_s15  ;;  %898 = vrot.lane.b32.xlu0 %v896_v25, %s1865_s20  ;;  %v1312_v24 = vstv %s1647_s4  ;;  %v1150_v25 = vstv %s1633_s17  ;;  %s1653_s4 = sld [smem:[#allocation3 + $0x30]]  ;;  %v1382_v14 = vmul.f32 %v1381_v10, %v2042_v55 }
 0x11d   : > { %v1313_v29 = vmul.f32 %v1312_v24, %v2114_v21  ;;  %s1562_s17 = sld [smem:[#allocation3 + $0x3f]] }
 0x11e   : > { %v1352_v11 = vstv %s1651_s28 }
 0x11f   : > { %v1353_v15 = vmul.f32 %v1352_v11, %v2114_v21 }
 0x120   : > { %1344 = vrot.lane.b32.xlu1 %v1342_v30, %s1863_s10  ;;  %1222 = vrot.lane.b32.xlu0 %v1220_v31, %s1865_s20  ;;  %v1151_v30 = vmul.f32 %v1150_v25, %v2114_v21  ;;  %v562_v31 = vstv %s1583_s5  ;;  %s1565_s5 = sld [smem:[#allocation3 + $0x1c]] }
 0x123   : > { %v338_v25 = vstv %s1562_s17 }
 0x124   : > { %1060 = vrot.lane.b32.xlu1 %v1058_v35, %s1865_s20  ;;  %331 = vrot.lane.b32.xlu0 %v329_v33, %s2673_s21  ;;  %v563_v35 = vmul.f32 %v562_v31, %v2114_v21  ;;  %v339_v32 = vmul.f32 %v338_v25, %v2042_v55 }
 0x126   : > { %v370_v24 = vstv %s1565_s5  ;;  %s1451_s5 = scalar_lea.sflag [#allocation5], %s1991_s29 }
 0x127   : > { %v371_v31 = vmul.f32 %v370_v24, %v2114_v21  ;;  %v299_v24 = vld [vmem:[#allocation2 + $0x1] ss:$2 sm:$0x3] }
 0x128   : > { %1364 = vrot.lane.b32.xlu1 %v1362_v38, %s1864_s15  ;;  %485 = vrot.lane.b32.xlu0 %v483_v37, %s2673_s21  ;;  %v1028_v37 = vstv %s1623_s7  ;;  %v704_v38 = vstv %s1595_s8  ;;  %s1567_s7 = sld [smem:[#allocation3 + $0x23]] }
 0x129   : > { %s1566_s8 = sld [smem:[#allocation3 + $0x4d]] }
 0x12c   : > { %789 = vrot.lane.b32.xlu0 %v787_v41, %s2672_s14  ;;  %309 = vrot.lane.b32.xlu1 %v307_v44, %s2672_s14  ;;  %v1029_v41 = vmul.f32 %v1028_v37, %v2114_v21  ;;  %v705_v44 = vmul.f32 %v704_v38, %v2114_v21 }
 0x12f   : > { %v380_v47 = vstv %s1566_s8 }
 0x130   : > { %647 = vrot.lane.b32.xlu0 %v645_v48, %s2673_s21  ;;  %465 = vrot.lane.b32.xlu1 %v463_v50, %s2672_s14 }
 0x134   : > { %1113 = vrot.lane.b32.xlu0 %v1111_v54, %s2672_s14  ;;  %627 = vrot.lane.b32.xlu1 %v625_v56, %s2672_s14  ;;  %v1190_v54 = vstv %s1637_s23  ;;  %v866_v56 = vstv %s1609_s0  ;;  %s1570_s23 = sld [smem:[#allocation3 + $0x5b]]  ;;  %s1869_s0 = smov 124  }
 0x138   : > { %971 = vrot.lane.b32.xlu0 %v969_v60, %s2673_s21  ;;  %951 = vrot.lane.b32.xlu1 %v949_v61, %s2672_s14  ;;  %v1191_v60 = vmul.f32 %v1190_v54, %v2114_v21  ;;  %v867_v61 = vmul.f32 %v866_v56, %v2114_v21  ;;  %v413_v54 = vmul.f32 %v412_v45, %v2114_v21 }
 0x139   : > { %v381_v56 = vmul.f32 %v380_v47, %v2042_v55 }
 0x13c   : > { %1275 = vrot.lane.b32.xlu0 %v1273_v0, %s2672_s14  ;;  %505 = vrot.lane.b32.xlu1 %v503_v1, %s1862_s11  ;;  %s1593_s14 = sld [smem:[#allocation3 + $0x1e]] }
 0x140   : > { %525 = vrot.lane.b32.xlu0 %v523_v4, %s1863_s10  ;;  %809 = vrot.lane.b32.xlu1 %v807_v5, %s2673_s21  ;;  %v1210_v4 = vstv %s1639_s30  ;;  %v1048_v5 = vstv %s1625_s26  ;;  %s1663_s30 = sshll.u32 %s1909_s13, 7  ;;  %s2677_s26 = sshll.u32 %s1991_s29, 3 }
 0x141   : > { %s171_s27 = scalar_lea.vmem [#allocation8], %s2677_s26  ;;  %s1463_s17 = scalar_lea.hbm %s2638_s2, %s1663_s30 }
 0x142   : > { %v684_v20 = vstv %s1593_s14  ;;  %s1563_s14 = sld [smem:[#allocation3 + $0x15]]  ;;  %s1465_s28 = sshll.u32 %s171_s27, 4  ;;  %s1466_s28 = int_to_ptr.vmem [resolvable:$true] %s1465_s28 }
 0x143   : > { %v685_v23 = vmul.f32 %v684_v20, %v2114_v21 }
 0x144   : > { %991 = vrot.lane.b32.xlu0 %v989_v8, %s1862_s11  ;;  %667 = vrot.lane.b32.xlu1 %v665_v9, %s1862_s11  ;;  %v1211_v8 = vmul.f32 %v1210_v4, %v2114_v21  ;;  %v1049_v9 = vmul.f32 %v1048_v5, %v2114_v21 }
 0x148   : > { %1295 = vrot.lane.b32.xlu0 %v1293_v12, %s2673_s21  ;;  %1133 = vrot.lane.b32.xlu1 %v1131_v13, %s2673_s21 }
 0x14c   : > { %545 = vrot.lane.b32.xlu0 %v543_v17, %s1864_s15  ;;  %829 = vrot.lane.b32.xlu1 %v827_v18, %s1862_s11  ;;  %v349_v17 = vstv %s1563_s14  ;;  %v1372_v18 = vstv %s1653_s4 }
 0x150   : > { %1011 = vrot.lane.b32.xlu0 %v1009_v22, %s1863_s10  ;;  %687 = vrot.lane.b32.xlu1 %v685_v23, %s1863_s10  ;;  %v350_v22 = vmul.f32 %v349_v17, %v2114_v21  ;;  %v1373_v23 = vmul.f32 %v1372_v18, %v2114_v21  ;;  %v295_v18 = vld [vmem:[#allocation2] ss:$2 sm:$0x3] }
 0x152   : > { %v2256_v26 = vpop.permute.xlu1 %320  ;;  %v2258_v28 = vpop.permute.xlu0 %474 }
 0x154   : > { %1315 = vrot.lane.b32.xlu0 %v1313_v29, %s1862_s11  ;;  %1153 = vrot.lane.b32.xlu1 %v1151_v30, %s1862_s11 }
 0x156   : > { %v2264_v33 = vpop.permute.xlu1 %636  ;;  %v2266_v34 = vpop.permute.xlu0 %798 }
 0x158   : > { %565 = vrot.lane.b32.xlu0 %v563_v35, %s1865_s20  ;;  %849 = vrot.lane.b32.xlu1 %v847_v36, %s1863_s10  ;;  %v391_v35 = vstv %s1567_s7  ;;  %v359_v36 = vstv %s1564_s6  ;;  %s1785_s6 = scalar_lea.vmem %s1466_s28, 128  ;;  %s1872_s7 = smov [#allocation8]  }
 0x159   : > { %p1786_p6 = scmp.ne.s32.totalorder %s1466_s28, %s1785_s6  ;;  %s1789_s13 = sshll.u32 %s1872_s7, 4  ;;  %s1790_s13 = int_to_ptr.vmem [resolvable:$false] %s1789_s13 }
 0x15a   : > { %v2272_v39 = vpop.permute.xlu1 %494  ;;  %v2274_v40 = vpop.permute.xlu0 %656  ;;  %s1791_s8 = scalar_lea.vmem %s1790_s13, 256  ;;  %p1792_p11 = scmp.lt.s32.totalorder %s1466_s28, %s1790_s13 }
 0x15b   : > { %p1787_p7 = pnand %p1786_p6, %p2678_p8  ;;  %p1793_p0 = scmp.lt.s32.totalorder %s1791_s8, %s1785_s6 }
 0x15c   : > { %1031 = vrot.lane.b32.xlu0 %v1029_v41, %s1864_s15  ;;  %707 = vrot.lane.b32.xlu1 %v705_v44, %s1864_s15  ;;  %v392_v41 = vmul.f32 %v391_v35, %v2114_v21  ;;  %v360_v44 = vmul.f32 %v359_v36, %v2042_v55 }
 0x15d   : > { %p1788_p10 = pneg %p1787_p7  ;;  %p1794_p3 = por %p1793_p0, %p1792_p11 }
 0x15e   : > { %v2280_v48 = vpop.permute.xlu1 %960  ;;  %v2282_v50 = vpop.permute.xlu0 %514 }
 0x15f   : > { %p1795_p5 = pnand %p1794_p3, %p1788_p10 }
 0x160   : > { %1335 = vrot.lane.b32.xlu0 %v1333_v51, %s1863_s10  ;;  %1173 = vrot.lane.b32.xlu1 %v1171_v52, %s1863_s10 }
 0x162   : > { %v2288_v58 = vpop.permute.xlu1 %1122  ;;  %v2290_v59 = vpop.permute.xlu0 %980 }
 0x164   : > { %1193 = vrot.lane.b32.xlu0 %v1191_v60, %s1864_s15  ;;  %869 = vrot.lane.b32.xlu1 %v867_v61, %s1864_s15  ;;  %v401_v60 = vstv %s1568_s22 }
 0x165   : > { %v402_v63 = vmul.f32 %v401_v60, %v2042_v55 }
 0x166   : > { %v2296_v0 = vpop.permute.xlu1 %818  ;;  %v2298_v1 = vpop.permute.xlu0 %1284 }
 0x168   : > { %889 = vrot.lane.b32.xlu0 %v887_v2, %s1865_s20  ;;  %727 = vrot.lane.b32.xlu1 %v725_v3, %s1865_s20  ;;  %v422_v2 = vstv %s1570_s23 }
 0x169   : > { %v423_v21 = vmul.f32 %v422_v2, %v2042_v55  ;;  %v476_v2 = vrot.slane %v2258_v28, 1 }
 0x16a   : > { %v2304_v6 = vpop.permute.xlu1 %676  ;;  %v2306_v7 = vpop.permute.xlu0 %534 }
 0x16c   : > { %1213 = vrot.lane.b32.xlu0 %v1211_v8, %s1865_s20  ;;  %1051 = vrot.lane.b32.xlu1 %v1049_v9, %s1865_s20 }
 0x16e   : > { %v2312_v12 = vpop.permute.xlu1 %1142  ;;  %v2314_v13 = vpop.permute.xlu0 %1000 }
 0x170   : > { %1384 = vrot.lane.b32.xlu0 %v1382_v14, %s1865_s20  ;;  %1355 = vrot.lane.b32.xlu1 %v1353_v15, %s1864_s15 }
 0x172   : > { %v2320_v19 = vpop.permute.xlu1 %838  ;;  %v2322_v20 = vpop.permute.xlu0 %1304 }
 0x174   : > { %352 = vrot.lane.b32.xlu0 %v350_v22, %s1862_s11  ;;  %1375 = vrot.lane.b32.xlu1 %v1373_v23, %s1865_s20 }
 0x176   : > { %v2328_v29 = vpop.permute.xlu1 %696  ;;  %v2330_v30 = vpop.permute.xlu0 %554 }
 0x178   : > { %373 = vrot.lane.b32.xlu0 %v371_v31, %s1863_s10  ;;  %341 = vrot.lane.b32.xlu1 %v339_v32, %s2673_s21  ;;  %s1558_s21 = sld [smem:[#allocation3 + $0x31]] }
 0x17a   : > { %v2336_v37 = vpop.permute.xlu1 %1162  ;;  %v2338_v38 = vpop.permute.xlu0 %1020 }
 0x17c   : > { %394 = vrot.lane.b32.xlu0 %v392_v41, %s1864_s15  ;;  %362 = vrot.lane.b32.xlu1 %v360_v44, %s1862_s11  ;;  %s293_s11 = sld [smem:[#allocation3]]  ;;  %v322_v41 = vrot.slane %v2256_v26, 1  ;;  %v800_v44 = vrot.slane %v2266_v34, 1 }
 0x17e   : > { %v2344_v51 = vpop.permute.xlu1 %858  ;;  %v2346_v52 = vpop.permute.xlu0 %1324  ;;  %v300_v25 = vstv %s1558_s21  ;;  %v801_v16 = vsel %vm312_vm10, %v2266_v34, %v800_v44  ;;  %v1124_v34 = vrot.slane %v2288_v58, 1 }
 0x17f   : > { %v301_v32 = vmul.f32 %v300_v25, %v299_v24  ;;  %v323_v25 = vsel %vm312_vm10, %v2256_v26, %v322_v41 }
 0x180   : > { %415 = vrot.lane.b32.xlu0 %v413_v54, %s1865_s20  ;;  %383 = vrot.lane.b32.xlu1 %v381_v56, %s1863_s10  ;;  %s1866_s10 = smov 127  }
 0x182   : > { %v2352_v61 = vpop.permute.xlu1 %716  ;;  %v2354_v62 = vpop.permute.xlu0 %574  ;;  %v296_v55 = vstv %s293_s11 }
 0x183   : > { %v297_v31 = vmul.f32 %v296_v55, %v295_v18 }
 0x184   : > { %404 = vrot.lane.b32.xlu1 %v402_v63, %s1864_s15  ;;  %s1867_s15 = smov 126  }
 0x185   : > { %v302_v54 = vadd.f32 %v301_v32, %v297_v31 }
 0x186   : > { %v2358_v3 = vpop.permute.xlu1 %1182  ;;  %v2360_v4 = vpop.permute.xlu0 %736 }
 0x188   : > { %425 = vrot.lane.b32.xlu1 %v423_v21, %s1865_s20  ;;  %s1868_s20 = smov 125  }
 0x18a   : > { %v2364_v5 = vpop.permute.xlu1 %878  ;;  %v2366_v8 = vpop.permute.xlu0 %1202 }
 0x18e   : > { %v2368_v9 = vpop.permute.xlu1 %1040  ;;  %v2370_v10 = vpop.permute.xlu0 %898 }
 0x192   : > { %v2372_v11 = vpop.permute.xlu1 %1344  ;;  %v2374_v14 = vpop.permute.xlu0 %1222 }
 0x196   : > { %v2376_v15 = vpop.permute.xlu1 %1060  ;;  %v332_v17 = vpop.permute.xlu0 %331 }
 0x197   : > { %v333_v56 = vrot.slane %v332_v17, 1 }
 0x19a   : > { %v2378_v22 = vpop.permute.xlu1 %1364  ;;  %v486_v23 = vpop.permute.xlu0 %485 }
 0x19b   : > { %2674 = vst [vmem:[#allocation15_spill] sm:$0xff] %v2378_v22  ;;  %v487_v44 = vrot.slane %v486_v23, 1 }
 0x19e   : > { %v310_v35 = vpop.permute.xlu1 %309  ;;  %v790_v36 = vpop.permute.xlu0 %789 }
 0x19f   : > { %v311_v45 = vrot.slane %v310_v35, 1  ;;  %v791_v47 = vrot.slane %v790_v36, 1 }
 0x1a1   : > { %v313_v60 = vsel %vm312_vm10, %v310_v35, %v311_v45  ;;  %v792_v63 = vsel %vm312_vm10, %v790_v36, %v791_v47  ;;  %v638_v35 = vrot.slane %v2264_v33, 1  ;;  %v335_v36 = vsel %vm334_vm11, %v332_v17, %v333_v56 }
 0x1a2   : > { %v315_v21 = vadd.f32 %v313_v60, %v302_v54  ;;  %v794_v55 = vadd.f32 %v792_v63, %v2145_v42  ;;  %v466_v18 = vpop.permute.xlu1 %465  ;;  %v648_v24 = vpop.permute.xlu0 %647  ;;  %v477_v42 = vsel %vm312_vm10, %v2258_v28, %v476_v2  ;;  %v658_v2 = vrot.slane %v2274_v40, 1 }
 0x1a3   : > { %v467_v22 = vrot.slane %v466_v18, 1  ;;  %v639_v17 = vsel %vm312_vm10, %v2264_v33, %v638_v35  ;;  %v1125_v33 = vsel %vm312_vm10, %v2288_v58, %v1124_v34  ;;  %v488_v35 = vsel %vm334_vm11, %v486_v23, %v487_v44 }
 0x1a4   : > { %v325_v31 = vadd.f32 %v323_v25, %v315_v21  ;;  %v2390_v32 = vadd.f32 %v801_v16, %v794_v55  ;;  %v659_v58 = vsel %vm334_vm11, %v2274_v40, %v658_v2 }
 0x1a5   : > { %v468_v45 = vsel %vm312_vm10, %v466_v18, %v467_v22  ;;  %v649_v22 = vrot.slane %v648_v24, 1 }
 0x1a6   : > { %v470_v47 = vadd.f32 %v468_v45, %v2147_v43  ;;  %v628_v26 = vpop.permute.xlu1 %627  ;;  %v1114_v41 = vpop.permute.xlu0 %1113  ;;  %v2398_v54 = vadd.f32 %v335_v36, %v325_v31  ;;  %v496_v43 = vrot.slane %v2272_v39, 1  ;;  %v962_v31 = vrot.slane %v2280_v48, 1 }
 0x1a7   : > { %v629_v16 = vrot.slane %v628_v26, 1  ;;  %v1115_v60 = vrot.slane %v1114_v41, 1  ;;  %v516_v45 = vrot.slane %v2282_v50, 1 }
 0x1a8   : > { %v479_v63 = vadd.f32 %v477_v42, %v470_v47 }
 0x1a9   : > { %v630_v56 = vsel %vm312_vm10, %v628_v26, %v629_v16  ;;  %v1116_v28 = vsel %vm312_vm10, %v1114_v41, %v1115_v60  ;;  %v497_v60 = vsel %vm334_vm11, %v2272_v39, %v496_v43 }
 0x1aa   : > { %v632_v21 = vadd.f32 %v630_v56, %v2153_v46  ;;  %v1118_v55 = vadd.f32 %v1116_v28, %v2157_v49  ;;  %v952_v18 = vpop.permute.xlu1 %951  ;;  %v972_v25 = vpop.permute.xlu0 %971  ;;  %v490_v47 = vadd.f32 %v488_v35, %v479_v63  ;;  %v982_v46 = vrot.slane %v2290_v59, 1 }
 0x1ab   : > { %v953_v36 = vrot.slane %v952_v18, 1  ;;  %v650_v49 = vsel %vm334_vm11, %v648_v24, %v649_v22  ;;  %v973_v16 = vrot.slane %v972_v25, 1  ;;  %v1286_v56 = vrot.slane %v2298_v1, 1 }
 0x1ac   : > { %v641_v42 = vadd.f32 %v639_v17, %v632_v21  ;;  %v2414_v26 = vadd.f32 %v1125_v33, %v1118_v55  ;;  %v963_v17 = vsel %vm312_vm10, %v2280_v48, %v962_v31  ;;  %v517_v28 = vsel %vm355_vm12, %v2282_v50, %v516_v45 }
 0x1ad   : > { %v954_v41 = vsel %vm312_vm10, %v952_v18, %v953_v36  ;;  %v499_v39 = vadd.f32 %v497_v60, %v490_v47  ;;  %v983_v40 = vsel %vm334_vm11, %v2290_v59, %v982_v46  ;;  %v820_v48 = vrot.slane %v2296_v0, 1 }
 0x1ae   : > { %v956_v23 = vadd.f32 %v954_v41, %v2162_v53  ;;  %v506_v34 = vpop.permute.xlu1 %505  ;;  %v1276_v44 = vpop.permute.xlu0 %1275  ;;  %v652_v63 = vadd.f32 %v650_v49, %v641_v42  ;;  %v974_v53 = vsel %vm334_vm11, %v972_v25, %v973_v16  ;;  %v1287_v36 = vsel %vm312_vm10, %v2298_v1, %v1286_v56 }
 0x1af   : > { %v507_v24 = vrot.slane %v506_v34, 1  ;;  %v1277_v22 = vrot.slane %v1276_v44, 1  ;;  %v536_v45 = vrot.slane %v2306_v7, 1  ;;  %v678_v16 = vrot.slane %v2304_v6, 1 }
 0x1b0   : > { %v965_v21 = vadd.f32 %v963_v17, %v956_v23  ;;  %v661_v43 = vadd.f32 %v659_v58, %v652_v63 }
 0x1b1   : > { %v508_v2 = vsel %vm355_vm12, %v506_v34, %v507_v24  ;;  %v1278_v55 = vsel %vm312_vm10, %v1276_v44, %v1277_v22  ;;  %v537_v34 = vsel %vm376_vm13, %v2306_v7, %v536_v45  ;;  %v1002_v44 = vrot.slane %v2314_v13, 1 }
 0x1b2   : > { %v976_v18 = vadd.f32 %v974_v53, %v965_v21  ;;  %v510_v31 = vadd.f32 %v508_v2, %v499_v39  ;;  %v1280_v33 = vadd.f32 %v1278_v55, %v2166_v57  ;;  %v810_v35 = vpop.permute.xlu1 %809  ;;  %v526_v50 = vpop.permute.xlu0 %525  ;;  %v821_v57 = vsel %vm334_vm11, %v2296_v0, %v820_v48 }
 0x1b3   : > { %v811_v59 = vrot.slane %v810_v35, 1  ;;  %v527_v42 = vrot.slane %v526_v50, 1  ;;  %v1003_v7 = vsel %vm355_vm12, %v2314_v13, %v1002_v44  ;;  %v1306_v2 = vrot.slane %v2322_v20, 1 }
 0x1b4   : > { %v519_v25 = vadd.f32 %v517_v28, %v510_v31  ;;  %v985_v47 = vadd.f32 %v983_v40, %v976_v18  ;;  %v1289_v46 = vadd.f32 %v1287_v36, %v1280_v33  ;;  %v679_v28 = vsel %vm355_vm12, %v2304_v6, %v678_v16 }
 0x1b5   : > { %v812_v49 = vsel %vm334_vm11, %v810_v35, %v811_v59  ;;  %v528_v41 = vsel %vm376_vm13, %v526_v50, %v527_v42  ;;  %v1307_v59 = vsel %vm334_vm11, %v2322_v20, %v1306_v2  ;;  %v556_v42 = vrot.slane %v2330_v30, 1 }
 0x1b6   : > { %v814_v60 = vadd.f32 %v812_v49, %v2390_v32  ;;  %v530_v1 = vadd.f32 %v528_v41, %v519_v25  ;;  %v668_v58 = vpop.permute.xlu1 %667  ;;  %v992_v23 = vpop.permute.xlu0 %991  ;;  %v1144_v32 = vrot.slane %v2312_v12, 1 }
 0x1b7   : > { %v669_v63 = vrot.slane %v668_v58, 1  ;;  %v993_v17 = vrot.slane %v992_v23, 1 }
 0x1b8   : > { %v823_v56 = vadd.f32 %v821_v57, %v814_v60  ;;  %v539_v24 = vadd.f32 %v537_v34, %v530_v1  ;;  %v1145_v6 = vsel %vm334_vm11, %v2312_v12, %v1144_v32 }
 0x1b9   : > { %v670_v22 = vsel %vm355_vm12, %v668_v58, %v669_v63  ;;  %v994_v0 = vsel %vm355_vm12, %v992_v23, %v993_v17  ;;  %v557_v58 = vsel %vm397_vm14, %v2330_v30, %v556_v42  ;;  %v1022_v23 = vrot.slane %v2338_v38, 1 }
 0x1ba   : > { %v672_v21 = vadd.f32 %v670_v22, %v661_v43  ;;  %v996_v39 = vadd.f32 %v994_v0, %v985_v47  ;;  %v1134_v40 = vpop.permute.xlu1 %1133  ;;  %v1296_v53 = vpop.permute.xlu0 %1295  ;;  %v840_v43 = vrot.slane %v2320_v19, 1 }
 0x1bb   : > { %v1135_v55 = vrot.slane %v1134_v40, 1  ;;  %v1297_v48 = vrot.slane %v1296_v53, 1  ;;  %v1023_v30 = vsel %vm376_vm13, %v2338_v38, %v1022_v23 }
 0x1bc   : > { %v681_v18 = vadd.f32 %v679_v28, %v672_v21  ;;  %v1005_v31 = vadd.f32 %v1003_v7, %v996_v39  ;;  %v1326_v39 = vrot.slane %v2346_v52, 1 }
 0x1bd   : > { %v1136_v33 = vsel %vm334_vm11, %v1134_v40, %v1135_v55  ;;  %v1298_v35 = vsel %vm334_vm11, %v1296_v53, %v1297_v48 }
 0x1be   : > { %v1138_v50 = vadd.f32 %v1136_v33, %v2414_v26  ;;  %v1300_v36 = vadd.f32 %v1298_v35, %v1289_v46  ;;  %v830_v45 = vpop.permute.xlu1 %829  ;;  %v546_v13 = vpop.permute.xlu0 %545  ;;  %v841_v26 = vsel %vm355_vm12, %v2320_v19, %v840_v43  ;;  %v698_v46 = vrot.slane %v2328_v29, 1 }
 0x1bf   : > { %v831_v25 = vrot.slane %v830_v45, 1  ;;  %v547_v47 = vrot.slane %v546_v13, 1  ;;  %v1327_v38 = vsel %vm355_vm12, %v2346_v52, %v1326_v39  ;;  %v576_v43 = vrot.slane %v2354_v62, 1 }
 0x1c0   : > { %v1147_v49 = vadd.f32 %v1145_v6, %v1138_v50  ;;  %v1309_v41 = vadd.f32 %v1307_v59, %v1300_v36  ;;  %v699_v19 = vsel %vm376_vm13, %v2328_v29, %v698_v46  ;;  %v2490_v59 = vsub.s32 0, %v2005_v27 }
 0x1c1   : > { %v832_v57 = vsel %vm355_vm12, %v830_v45, %v831_v25  ;;  %v548_v12 = vsel %vm397_vm14, %v546_v13, %v547_v47  ;;  %v2496_v47 = vsub.s32 1, %v2005_v27  ;;  %v1042_v46 = vrot.slane %v2368_v9, 1 }
 0x1c2   : > { %v834_v16 = vadd.f32 %v832_v57, %v823_v56  ;;  %v550_v60 = vadd.f32 %v548_v12, %v539_v24  ;;  %v688_v1 = vpop.permute.xlu1 %687  ;;  %v1012_v20 = vpop.permute.xlu0 %1011  ;;  %v1164_v56 = vrot.slane %v2336_v37, 1 }
 0x1c3   : > { %v689_v34 = vrot.slane %v688_v1, 1  ;;  %v1013_v44 = vrot.slane %v1012_v20, 1 }
 0x1c4   : > { %v843_v63 = vadd.f32 %v841_v26, %v834_v16  ;;  %v559_v17 = vadd.f32 %v557_v58, %v550_v60  ;;  %v1165_v29 = vsel %vm355_vm12, %v2336_v37, %v1164_v56  ;;  %v718_v37 = vrot.slane %v2352_v61, 1 }
 0x1c5   : > { %v690_v22 = vsel %vm376_vm13, %v688_v1, %v689_v34  ;;  %v1014_v0 = vsel %vm376_vm13, %v1012_v20, %v1013_v44  ;;  %v577_v26 = vsel %vm418_vm15, %v2354_v62, %v576_v43  ;;  %v2504_v58 = vsub.s32 2, %v2005_v27 }
 0x1c6   : > { %v692_v24 = vadd.f32 %v690_v22, %v681_v18  ;;  %v1016_v28 = vadd.f32 %v1014_v0, %v1005_v31  ;;  %v1154_v32 = vpop.permute.xlu1 %1153  ;;  %v1316_v21 = vpop.permute.xlu0 %1315  ;;  %v860_v18 = vrot.slane %v2344_v51, 1  ;;  %v719_v23 = vsel %vm397_vm14, %v2352_v61, %v718_v37 }
 0x1c7   : > { %v1155_v40 = vrot.slane %v1154_v32, 1  ;;  %v1317_v53 = vrot.slane %v1316_v21, 1  ;;  %v1043_v27 = vsel %vm397_vm14, %v2368_v9, %v1042_v46  ;;  %v1346_v56 = vrot.slane %v2372_v11, 1 }
 0x1c8   : > { %v701_v7 = vadd.f32 %v699_v19, %v692_v24  ;;  %v1025_v2 = vadd.f32 %v1023_v30, %v1016_v28  ;;  %v861_v52 = vsel %vm376_vm13, %v2344_v51, %v860_v18  ;;  %v1184_v51 = vrot.slane %v2358_v3, 1 }
 0x1c9   : > { %v1156_v55 = vsel %vm355_vm12, %v1154_v32, %v1155_v40  ;;  %v1318_v48 = vsel %vm355_vm12, %v1316_v21, %v1317_v53  ;;  %v880_v40 = vrot.slane %v2364_v5, 1  ;;  %v900_v43 = vrot.slane %v2370_v10, 1 }
 0x1ca   : > { %v1158_v31 = vadd.f32 %v1156_v55, %v1147_v49  ;;  %v1320_v33 = vadd.f32 %v1318_v48, %v1309_v41  ;;  %v850_v35 = vpop.permute.xlu1 %849  ;;  %v566_v6 = vpop.permute.xlu0 %565  ;;  %v1185_v21 = vsel %vm376_vm13, %v2358_v3, %v1184_v51  ;;  %v1204_v48 = vrot.slane %v2366_v8, 1 }
 0x1cb   : > { %v851_v50 = vrot.slane %v850_v35, 1  ;;  %v567_v36 = vrot.slane %v566_v6, 1 }
 0x1cc   : > { %v1167_v45 = vadd.f32 %v1165_v29, %v1158_v31  ;;  %v1329_v13 = vadd.f32 %v1327_v38, %v1320_v33  ;;  %v1347_v29 = vsel %vm376_vm13, %v2372_v11, %v1346_v56  ;;  %v738_v38 = vrot.slane %v2360_v4, 1  ;;  %v2675_v56 = vld [vmem:[#allocation15_spill] sm:$0xff] }
 0x1cd   : > { %v852_v42 = vsel %vm376_vm13, %v850_v35, %v851_v50  ;;  %v568_v25 = vsel %vm418_vm15, %v566_v6, %v567_v36  ;;  %v881_v11 = vsel %vm397_vm14, %v2364_v5, %v880_v40  ;;  %v1205_v37 = vsel %vm397_vm14, %v2366_v8, %v1204_v48 }
 0x1ce   : > { %v854_v49 = vadd.f32 %v852_v42, %v843_v63  ;;  %v570_v41 = vadd.f32 %v568_v25, %v559_v17  ;;  %v708_v57 = vpop.permute.xlu1 %707  ;;  %v1032_v12 = vpop.permute.xlu0 %1031  ;;  %v1224_v8 = vrot.slane %v2374_v14, 1 }
 0x1cf   : > { %v709_v16 = vrot.slane %v708_v57, 1  ;;  %v1033_v60 = vrot.slane %v1032_v12, 1 }
 0x1d0   : > { %v579_v1 = vadd.f32 %v577_v26, %v570_v41  ;;  %v863_v20 = vadd.f32 %v861_v52, %v854_v49  ;;  %v901_v26 = vsel %vm418_vm15, %v2370_v10, %v900_v43 }
 0x1d1   : > { %v710_v34 = vsel %vm397_vm14, %v708_v57, %v709_v16  ;;  %v1034_v44 = vsel %vm397_vm14, %v1032_v12, %v1033_v60  ;;  %v739_v12 = vsel %vm418_vm15, %v2360_v4, %v738_v38 }
 0x1d2   : > { %v712_v63 = vadd.f32 %v710_v34, %v701_v7  ;;  %v1036_v62 = vadd.f32 %v1034_v44, %v1025_v2  ;;  %v1174_v17 = vpop.permute.xlu1 %1173  ;;  %v1336_v22 = vpop.permute.xlu0 %1335  ;;  %v594_v0 = vrot.slane %v579_v1, %v2496_v47  ;;  %v590_v19 = vrot.slane %v579_v1, %v2490_v59 }
 0x1d3   : > { %v1175_v61 = vrot.slane %v1174_v17, 1  ;;  %v1337_v24 = vrot.slane %v1336_v22, 1  ;;  %v598_v55 = vrot.slane %v579_v1, %v2504_v58  ;;  %v1062_v1 = vrot.slane %v2376_v15, 1 }
 0x1d4   : > { %601 = vrot.lane.b32.xlu1 %v594_v0, %s1866_s10  ;;  %599 = vrot.lane.b32.xlu0 %v590_v19, %s1866_s10  ;;  %v721_v28 = vadd.f32 %v719_v23, %v712_v63  ;;  %v1045_v32 = vadd.f32 %v1043_v27, %v1036_v62  ;;  %v1225_v19 = vsel %vm418_vm15, %v2374_v14, %v1224_v8 }
 0x1d5   : > { %v1176_v30 = vsel %vm376_vm13, %v1174_v17, %v1175_v61  ;;  %v1338_v39 = vsel %vm376_vm13, %v1336_v22, %v1337_v24  ;;  %v1063_v27 = vsel %vm418_vm15, %v2376_v15, %v1062_v1  ;;  %v1366_v61 = vrot.slane %v2675_v56, 1 }
 0x1d6   : > { %v1178_v53 = vadd.f32 %v1176_v30, %v1167_v45  ;;  %v1340_v9 = vadd.f32 %v1338_v39, %v1329_v13  ;;  %v870_v7 = vpop.permute.xlu1 %869  ;;  %v1194_v2 = vpop.permute.xlu0 %1193 }
 0x1d7   : > { %v871_v18 = vrot.slane %v870_v7, 1  ;;  %v1195_v31 = vrot.slane %v1194_v2, 1  ;;  %v1367_v15 = vsel %vm397_vm14, %v2675_v56, %v1366_v61 }
 0x1d8   : > { %v1187_v3 = vadd.f32 %v1185_v21, %v1178_v53  ;;  %603 = vrot.lane.b32.xlu0 %v598_v55, %s1866_s10  ;;  %v1349_v33 = vadd.f32 %v1347_v29, %v1340_v9 }
 0x1d9   : > { %v872_v35 = vsel %vm397_vm14, %v870_v7, %v871_v18  ;;  %v1196_v6 = vsel %vm397_vm14, %v1194_v2, %v1195_v31 }
 0x1da   : > { %v874_v50 = vadd.f32 %v872_v35, %v863_v20  ;;  %v1198_v36 = vadd.f32 %v1196_v6, %v1187_v3  ;;  %v728_v45 = vpop.permute.xlu1 %727  ;;  %v890_v13 = vpop.permute.xlu0 %889 }
 0x1db   : > { %v729_v42 = vrot.slane %v728_v45, 1  ;;  %v891_v25 = vrot.slane %v890_v13, 1 }
 0x1dc   : > { %v883_v52 = vadd.f32 %v881_v11, %v874_v50  ;;  %v1207_v49 = vadd.f32 %v1205_v37, %v1198_v36 }
 0x1dd   : > { %v730_v41 = vsel %vm418_vm15, %v728_v45, %v729_v42  ;;  %v892_v57 = vsel %vm418_vm15, %v890_v13, %v891_v25 }
 0x1de   : > { %v732_v46 = vadd.f32 %v730_v41, %v721_v28  ;;  %v894_v16 = vadd.f32 %v892_v57, %v883_v52  ;;  %v1052_v5 = vpop.permute.xlu1 %1051  ;;  %v1214_v60 = vpop.permute.xlu0 %1213 }
 0x1df   : > { %v1053_v20 = vrot.slane %v1052_v5, 1  ;;  %v1215_v23 = vrot.slane %v1214_v60, 1 }
 0x1e0   : > { %v741_v51 = vadd.f32 %v739_v12, %v732_v46  ;;  %v903_v34 = vadd.f32 %v901_v26, %v894_v16 }
 0x1e1   : > { %v1054_v44 = vsel %vm418_vm15, %v1052_v5, %v1053_v20  ;;  %v1216_v63 = vsel %vm418_vm15, %v1214_v60, %v1215_v23 }
 0x1e2   : > { %v1056_v4 = vadd.f32 %v1054_v44, %v1045_v32  ;;  %v1218_v62 = vadd.f32 %v1216_v63, %v1207_v49  ;;  %v1356_v17 = vpop.permute.xlu1 %1355  ;;  %v1385_v10 = vpop.permute.xlu0 %1384  ;;  %v752_v22 = vrot.slane %v741_v51, %v2490_v59  ;;  %v756_v0 = vrot.slane %v741_v51, %v2496_v47 }
 0x1e3   : > { %v1357_v24 = vrot.slane %v1356_v17, 1  ;;  %v760_v53 = vrot.slane %v741_v51, %v2504_v58  ;;  %v914_v14 = vrot.slane %v903_v34, %v2490_v59  ;;  %v918_v55 = vrot.slane %v903_v34, %v2496_v47 }
 0x1e4   : > { %v1065_v28 = vadd.f32 %v1063_v27, %v1056_v4  ;;  %v2550_v21 = vadd.f32 %v1225_v19, %v1218_v62  ;;  %761 = vrot.lane.b32.xlu1 %v752_v22, %s1867_s15  ;;  %763 = vrot.lane.b32.xlu0 %v756_v0, %s1867_s15  ;;  %v922_v48 = vrot.slane %v903_v34, %v2504_v58  ;;  %v1386_v37 = vrot.slane %v1385_v10, 1 }
 0x1e5   : > { %v1358_v32 = vsel %vm397_vm14, %v1356_v17, %v1357_v24 }
 0x1e6   : > { %v1360_v30 = vadd.f32 %v1358_v32, %v1349_v33  ;;  %v1376_v39 = vpop.permute.xlu1 %1375  ;;  %v353_v40 = vpop.permute.xlu0 %352  ;;  %v1076_v38 = vrot.slane %v1065_v28, %v2490_v59  ;;  %v1080_v43 = vrot.slane %v1065_v28, %v2496_v47  ;;  %v1084_v49 = vrot.slane %v1065_v28, %v2504_v58 }
 0x1e7   : > { %v1377_v29 = vrot.slane %v1376_v39, 1  ;;  %v354_v18 = vrot.slane %v353_v40, 1  ;;  %v1238_v41 = vrot.slane %v2550_v21, %v2490_v59  ;;  %v1387_v5 = vsel %vm418_vm15, %v1385_v10, %v1386_v37 }
 0x1e8   : > { %v1369_v9 = vadd.f32 %v1367_v15, %v1360_v30  ;;  %765 = vrot.lane.b32.xlu1 %v760_v53, %s1867_s15  ;;  %923 = vrot.lane.b32.xlu0 %v914_v14, %s1868_s20  ;;  %v1242_v23 = vrot.slane %v2550_v21, %v2496_v47  ;;  %v1246_v51 = vrot.slane %v2550_v21, %v2504_v58  ;;  %v2676_v14 = vlaneseq }
 0x1e9   : > { %v1378_v50 = vsel %vm418_vm15, %v1376_v39, %v1377_v29  ;;  %v356_v36 = vsel %vm355_vm12, %v353_v40, %v354_v18 }
 0x1ea   : > { %v342_v7 = vpop.permute.xlu1 %341  ;;  %v374_v2 = vpop.permute.xlu0 %373  ;;  %v267_v15 = vand.u32 127, %v2676_v14 }
 0x1eb   : > { %v343_v31 = vrot.slane %v342_v7, 1  ;;  %v375_v45 = vrot.slane %v374_v2, 1 }
 0x1ec   : > { %925 = vrot.lane.b32.xlu1 %v918_v55, %s1868_s20  ;;  %927 = vrot.lane.b32.xlu0 %v922_v48, %s1868_s20  ;;  %v273_v55 = vand.u32 15, %v267_v15 }
 0x1ed   : > { %v344_v3 = vsel %vm334_vm11, %v342_v7, %v343_v31  ;;  %v377_v57 = vsel %vm376_vm13, %v374_v2, %v375_v45  ;;  %v268_v2 = vadd.s32 128, %v267_v15  ;;  %vm1253_vm11 = vcmask 1006592  }
 0x1ee   : > { %v346_v33 = vadd.f32 %v344_v3, %v2398_v54  ;;  %v363_v35 = vpop.permute.xlu1 %362  ;;  %v395_v6 = vpop.permute.xlu0 %394  ;;  %v1380_v54 = vadd.f32 %v1378_v50, %v1369_v9  ;;  %vm580_vm2 = vcmp.ge.s32.totalorder %v273_v55, 2  ;;  %vm431_vm3 = vcmp.ge.s32.totalorder %v273_v55, 3 }
 0x1ef   : > { %v364_v13 = vrot.slane %v363_v35, 1  ;;  %v396_v12 = vrot.slane %v395_v6, 1  ;;  %v280_v18 = vand.u32 15, %v268_v2  ;;  %vm742_vm5 = vcmp.ge.s32.totalorder %v273_v55, 1 }
 0x1f0   : > { %v358_v11 = vadd.f32 %v356_v36, %v346_v33  ;;  %1085 = vrot.lane.b32.xlu1 %v1076_v38, %s1869_s0  ;;  %1087 = vrot.lane.b32.xlu0 %v1080_v43, %s1869_s0  ;;  %v1389_v8 = vadd.f32 %v1387_v5, %v1380_v54  ;;  %vm1068_vm10 = vcmp.lt.s32.totalorder %v273_v55, 15 }
 0x1f1   : > { %v365_v42 = vsel %vm355_vm12, %v363_v35, %v364_v13  ;;  %v398_v34 = vsel %vm397_vm14, %v395_v6, %v396_v12  ;;  %vm581_vm4 = vcmp.ge.s32.totalorder %v280_v18, 2  ;;  %vm432_vm7 = vcmp.ge.s32.totalorder %v280_v18, 3 }
 0x1f2   : > { %v367_v25 = vadd.f32 %v365_v42, %v358_v11  ;;  %v384_v52 = vpop.permute.xlu1 %383  ;;  %v416_v16 = vpop.permute.xlu0 %415  ;;  %v1404_v22 = vrot.slane %v1389_v8, %v2496_v47  ;;  %v1400_v0 = vrot.slane %v1389_v8, %v2490_v59  ;;  %v1408_v28 = vrot.slane %v1389_v8, %v2504_v58 }
 0x1f3   : > { %v385_v26 = vrot.slane %v384_v52, 1  ;;  %v417_v44 = vrot.slane %v416_v16, 1  ;;  %vm743_vm8 = vcmp.ge.s32.totalorder %v280_v18, 1  ;;  %vm1230_vm12 = vcmp.lt.s32.totalorder %v273_v55, 14 }
 0x1f4   : > { %v379_v46 = vadd.f32 %v377_v57, %v367_v25  ;;  %1089 = vrot.lane.b32.xlu1 %v1084_v49, %s1869_s0  ;;  %1247 = vrot.lane.b32.xlu0 %v1238_v41, %s1870_s1 }
 0x1f5   : > { %v386_v60 = vsel %vm376_vm13, %v384_v52, %v385_v26  ;;  %v419_v19 = vsel %vm418_vm15, %v416_v16, %v417_v44  ;;  %vm1069_vm13 = vcmp.lt.s32.totalorder %v280_v18, 15 }
 0x1f6   : > { %v388_v1 = vadd.f32 %v386_v60, %v379_v46  ;;  %v405_v20 = vpop.permute.xlu1 %404 }
 0x1f7   : > { %v406_v63 = vrot.slane %v405_v20, 1 }
 0x1f8   : > { %v400_v4 = vadd.f32 %v398_v34, %v388_v1  ;;  %1249 = vrot.lane.b32.xlu1 %v1242_v23, %s1870_s1  ;;  %1251 = vrot.lane.b32.xlu0 %v1246_v51, %s1870_s1 }
 0x1f9   : > { %v407_v62 = vsel %vm397_vm14, %v405_v20, %v406_v63  ;;  %vm1415_vm14 = vcmask 998400  }
 0x1fa   : > { %v409_v17 = vadd.f32 %v407_v62, %v400_v4  ;;  %v426_v10 = vpop.permute.xlu1 %425 }
 0x1fb   : > { %v427_v27 = vrot.slane %v426_v10, 1 }
 0x1fc   : > { %v421_v56 = vadd.f32 %v419_v19, %v409_v17  ;;  %1411 = vrot.lane.b32.xlu0 %v1404_v22, %s1871_s24  ;;  %1409 = vrot.lane.b32.xlu1 %v1400_v0, %s1871_s24 }
 0x1fd   : > { %v428_v61 = vsel %vm418_vm15, %v426_v10, %v427_v27  ;;  %vm1231_vm15 = vcmp.lt.s32.totalorder %v280_v18, 14 }
 0x1fe   : > { %v430_v24 = vadd.f32 %v428_v61, %v421_v56 }
 0x200   : > { %v445_v21 = vrot.slane %v430_v24, %v2496_v47  ;;  %1413 = vrot.lane.b32.xlu1 %v1408_v28, %s1871_s24  ;;  %v441_v47 = vrot.slane %v430_v24, %v2490_v59 }
 0x202   : > { %v448_v43 = vsel %vm431_vm3, %v441_v47, 0.0  ;;  %v449_v42 = vsel %vm432_vm7, %v445_v21, 0.0 }
 0x246   : > { %v600_v32 = vpop.permute.xlu0 %599  ;;  %v602_v30 = vpop.permute.xlu1 %601 }
 0x247   : > { %v606_v58 = vsel %vm605_vm0, %v600_v32, %v602_v30 }
 0x248   : > { %v610_v6 = vsel %vm580_vm2, %v606_v58, 0.0 }
 0x249   : > { %v612_v11 = vadd.f32 %v610_v6, %v448_v43 }
 0x24a   : > { %v604_v39 = vpop.permute.xlu0 %603 }
 0x24b   : > { %v607_v33 = vsel %vm605_vm0, %v602_v30, %v604_v39  ;;  %vm1392_vm0 = vcmp.lt.s32.totalorder %v273_v55, 13 }
 0x24c   : > { %v611_v50 = vsel %vm581_vm4, %v607_v33, 0.0 }
 0x24d   : > { %v613_v52 = vadd.f32 %v611_v50, %v449_v42 }
 0x256   : > { %v762_v40 = vpop.permute.xlu1 %761  ;;  %v764_v53 = vpop.permute.xlu0 %763 }
 0x257   : > { %v768_v35 = vsel %vm767_vm1, %v762_v40, %v764_v53 }
 0x258   : > { %v772_v36 = vsel %vm742_vm5, %v768_v35, 0.0 }
 0x259   : > { %v774_v49 = vadd.f32 %v772_v36, %v612_v11 }
 0x25a   : > { %v766_v9 = vpop.permute.xlu1 %765  ;;  %v924_v7 = vpop.permute.xlu0 %923 }
 0x25b   : > { %v769_v38 = vsel %vm767_vm1, %v764_v53, %v766_v9  ;;  %vm1393_vm1 = vcmp.lt.s32.totalorder %v280_v18, 13 }
 0x25c   : > { %v773_v54 = vsel %vm743_vm8, %v769_v38, 0.0 }
 0x25d   : > { %v775_v26 = vadd.f32 %v773_v54, %v613_v52 }
 0x25e   : > { %v926_v48 = vpop.permute.xlu1 %925  ;;  %v928_v29 = vpop.permute.xlu0 %927 }
 0x25f   : > { %v930_v25 = vsel %vm929_vm9, %v924_v7, %v926_v48  ;;  %v931_v60 = vsel %vm929_vm9, %v926_v48, %v928_v29  ;;  %v1745_v7 = vld [vmem:[%s1997_s3] sm:$0xff] }
 0x260   : > { %v936_v46 = vadd.f32 %v930_v25, %v774_v49  ;;  %v937_v44 = vadd.f32 %v931_v60, %v775_v26 }
 0x262   : > { %v1086_v31 = vpop.permute.xlu1 %1085  ;;  %v1088_v3 = vpop.permute.xlu0 %1087 }
 0x263   : > { %v1092_v37 = vsel %vm1091_vm6, %v1086_v31, %v1088_v3 }
 0x264   : > { %v1096_v41 = vsel %vm1068_vm10, %v1092_v37, 0.0 }
 0x265   : > { %v1098_v1 = vadd.f32 %v1096_v41, %v936_v46 }
 0x266   : > { %v1090_v45 = vpop.permute.xlu1 %1089  ;;  %v1248_v13 = vpop.permute.xlu0 %1247 }
 0x267   : > { %v1093_v16 = vsel %vm1091_vm6, %v1088_v3, %v1090_v45 }
 0x268   : > { %v1097_v23 = vsel %vm1069_vm13, %v1093_v16, 0.0 }
 0x269   : > { %v1099_v10 = vadd.f32 %v1097_v23, %v937_v44 }
 0x26a   : > { %v1250_v57 = vpop.permute.xlu1 %1249  ;;  %v1252_v12 = vpop.permute.xlu0 %1251 }
 0x26b   : > { %v1254_v5 = vsel %vm1253_vm11, %v1248_v13, %v1250_v57  ;;  %v1255_v20 = vsel %vm1253_vm11, %v1250_v57, %v1252_v12 }
 0x26c   : > { %v1258_v8 = vsel %vm1230_vm12, %v1254_v5, 0.0  ;;  %v1259_v62 = vsel %vm1231_vm15, %v1255_v20, 0.0 }
 0x26d   : > { %v1260_v63 = vadd.f32 %v1258_v8, %v1098_v1  ;;  %v1261_v19 = vadd.f32 %v1259_v62, %v1099_v10 }
 0x26e   : > { %v1410_v51 = vpop.permute.xlu1 %1409  ;;  %v1412_v34 = vpop.permute.xlu0 %1411 }
 0x26f   : > { %v1416_v4 = vsel %vm1415_vm14, %v1410_v51, %v1412_v34 }
 0x270   : > { %v1420_v17 = vsel %vm1392_vm0, %v1416_v4, 0.0 }
 0x271   : > { %v1422_v22 = vadd.f32 %v1420_v17, %v1260_v63 }
 0x272   : > { %v1414_v0 = vpop.permute.xlu1 %1413 }
 0x273   : > { %v1655_v27 = vmul.f32 -1.442695, %v1422_v22  ;;  %v1417_v56 = vsel %vm1415_vm14, %v1412_v34, %v1414_v0 }
 0x274   : > { %v1421_v61 = vsel %vm1393_vm1, %v1417_v56, 0.0 }
 0x275   : > { %1737 = vpow2.f32 %v1655_v27  ;;  %v1423_v24 = vadd.f32 %v1421_v61, %v1261_v19 }
 0x277   : > { %v1656_v28 = vmul.f32 -1.442695, %v1423_v24 }
 0x279   : > { %1739 = vpow2.f32 %v1656_v28 }
 0x282   : > { %v1738_v21 = vpop.eup %1737 }
 0x283   : > { %v1430_v32 = vadd.f32 1.0, %v1738_v21 }
 0x285   : > { %1741 = vrcp.f32 %v1430_v32 }
 0x286   : > { %v1740_v30 = vpop.eup %1739 }
 0x287   : > { %v1431_v39 = vadd.f32 1.0, %v1740_v30 }
 0x289   : > { %1743 = vrcp.f32 %v1431_v39 }
 0x292   : > { %v1742_v40 = vpop.eup %1741 }
 0x293   : > { %v1439_v14 = vrot.slane %v1742_v40, %v2490_v59 }
 0x296   : > { %v1744_v53 = vpop.eup %1743 }
 0x297   : > { %v1443_v15 = vrot.slane %v1744_v53, %v2490_v59 }
 0x299   : > { %v1446_v9 = vcombine.low %v1439_v14, %v1443_v15 }
 0x29b   : > { %v1448_v2 = vmul.f32 %v1745_v7, %v1446_v9 }
 0x29d   : > { %1449 = vst [vmem:[%s171_s27] sm:$0xff] %v1448_v2 }
 0x29e   : > { %1798 = shalt.err (!%p1795_p5)
}
 0x29f   : > { %s1799_s3 = scalar_lea.hbm %s1463_s17, 128  ;;  %s1803_s22 = scalar_lea.hbm %s2638_s2, 256 }
 0x2a0   : > { %p1800_p2 = scmp.ne.s32.totalorder %s1463_s17, %s1799_s3  ;;  %p1804_p9 = scmp.lt.s32.totalorder %s1463_s17, %s2638_s2 }
 0x2a1   : > { %p1805_p1 = scmp.lt.s32.totalorder %s1803_s22, %s1799_s3 }
 0x2a2   : > { %p1801_p12 = pnand %p1800_p2, %p2678_p8 }
 0x2a3   : > { %p1806_p4 = por %p1805_p1, %p1804_p9 }
 0x2a4   : > { %p1802_p13 = pneg %p1801_p12 }
 0x2a6   : > { %p1807_p6 = pnand %p1806_p4, %p1802_p13 }
 0x2a8   : > { %1810 = shalt.err (!%p1807_p6)
}
 0x2a9   : > { %1670 = dma.vmem_to_hbm [thread:$0]  (%p2678_p8), %s1466_s28, 128, %s1463_s17, %s1451_s5  }
 0x2aa PF: > { %s1477_s21 = sand.u32 1, %s1841_s9   ;;  %p2679_p7 = scmp.ne.s32.totalorder %s2657_s16, 0 }
 0x2ab   : > { %p2680_p10 = scmp.ge.s32.totalorder %s1853_s12, 2  ;;  %s1478_s10 = scalar_lea.sflag [#allocation5], %s1477_s21 }
 0x2ad   : > { %p1681_p11 = pnand %p2680_p10, %p2679_p7 }
 0x2af   : > { %p1682_p0 = pneg %p1681_p11 }
 0x2b1   : > { %1836 = dma.done.wait (%p1682_p0), %s1478_s10, 128  }
 0x2b2   : > { %1838 = vsyncadd (%p1682_p0), %s1478_s10, 4294967168  ;;  %s2681_s9 = sld [smem:[#allocation12_spill]]  ;;  %p16_p3 = scmp.ge.s32.totalorder %s1934_s18, 4  }
 0x2b3   : > { %s2682_s10 = sld [smem:[#allocation13_spill]]  ;;  %s2684_s12 = smov %s1934_s18 }
 0x2b4   : > { %s2683_s11 = sld [smem:[#allocation14_spill]]  ;;  %18 = sbr.rel (!%p16_p3) target bundleno = 9 (0x9), region = 79 }
 0x2b9   :  { %1483 = vsyncpa [#allocation4], 1 }
 0x2ba   :  { %1485 = vsyncpa [#allocation4 + $0x1], 1 }
 0x2bb   :  { %1486 = vsyncpa [#allocation5], 1 }
 0x2bc   :  { %1488 = vsyncpa [#allocation5 + $0x1], 1 }
 0x2bd   :  { %1489 = vsyncpa [#allocation6], 1 }
 0x2be   :  { %1491 = vsyncpa [#allocation6 + $0x1], 1 }

</bundles_post_ra>
